<compile_context>
chip_gen: v7x
topology: tpu7x:2x2x1
jax: 0.10.0
libtpu: 0.0.40
codegen_flags: <defaults>
</compile_context>

<pallas_src>
import functools
import math

import jax
import jax.numpy as jnp
from jax import lax
from jax.experimental import pallas as pl
from jax.experimental.pallas import tpu as pltpu


# Preferred tile sizes (re-derive / shrink for v7x's 64 MiB VMEM if scaling up).
_TM_PREF = 512    # rows per output tile (matmul-only kernel)
_TN_PREF = 768    # output columns per tile
_TK_PREF = 512    # contraction chunk
_LANE = 128
_SUBLANE = 8


def _pick_tile(dim, preferred, granule):
    """Largest multiple of `granule` <= preferred that divides dim, else dim.

    Never returns a lane/sublane tile below `granule` unless it equals the full
    dimension (full-dim blocks are always legal for BlockSpec).
    """
    if dim <= preferred:
        return dim
    t = (preferred // granule) * granule
    while t >= granule:
        if dim % t == 0:
            return t
        t -= granule
    return dim


def _vmem_limit(block_bytes, scratch_bytes=0):
    """Scoped-VMEM budget: double-buffered blocks + scratch + headroom, clamped."""
    est = 2 * block_bytes + scratch_bytes + (2 << 20)
    return int(min(max(est, 32 << 20), 64 << 20))


# ----------------------------------------------------------------------------
# In-kernel math helpers
# ----------------------------------------------------------------------------
def _erf(x):
    # Abramowitz & Stegun 7.1.26 rational approximation, |err| <= 1.5e-7.
    # Uses only exp + basic VPU ops (safe Mosaic lowering).
    p = 0.3275911
    a1, a2, a3, a4, a5 = (0.254829592, -0.284496736, 1.421413741,
                          -1.453152027, 1.061405429)
    ax = jnp.abs(x)
    t = 1.0 / (1.0 + p * ax)
    poly = ((((a5 * t + a4) * t + a3) * t + a2) * t + a1) * t
    y = 1.0 - poly * jnp.exp(-ax * ax)
    return jnp.where(x >= 0.0, y, -y)


def _gelu_erf(x):
    return 0.5 * x * (1.0 + _erf(x * 0.7071067811865476))


# ----------------------------------------------------------------------------
# Pallas kernels
# ----------------------------------------------------------------------------
def _mm_bias_kernel(x_ref, w_ref, b_ref, o_ref, acc_ref, *, activation):
    """o = act(x @ w + b), tiled over (M, N, K) with an f32 VMEM accumulator."""
    @pl.when(pl.program_id(2) == 0)
    def _():
        acc_ref[...] = jnp.zeros_like(acc_ref)

    acc_ref[...] += jnp.dot(x_ref[...], w_ref[...],
                            preferred_element_type=jnp.float32)

    @pl.when(pl.program_id(2) == pl.num_programs(2) - 1)
    def _():
        acc = acc_ref[...] + b_ref[...].astype(jnp.float32)
        if activation == "gelu":           # exact-erf GELU (BERT), f32 epilogue
            acc = _gelu_erf(acc)
        elif activation == "tanh":
            acc = jnp.tanh(acc)
        o_ref[...] = acc.astype(o_ref.dtype)


def _mm_bias_add_ln_kernel(x_ref, w_ref, b_ref, res_ref, g_ref, beta_ref,
                           o_ref, acc_ref, *, eps):
    """o = LayerNorm(x @ w + b + residual) * gamma + beta (LN over the full N dim)."""
    @pl.when(pl.program_id(1) == 0)
    def _():
        acc_ref[...] = jnp.zeros_like(acc_ref)

    acc_ref[...] += jnp.dot(x_ref[...], w_ref[...],
                            preferred_element_type=jnp.float32)

    @pl.when(pl.program_id(1) == pl.num_programs(1) - 1)
    def _():
        h = (acc_ref[...] + b_ref[...].astype(jnp.float32)
             + res_ref[...].astype(jnp.float32))
        mean = jnp.mean(h, axis=-1, keepdims=True)
        c = h - mean
        var = jnp.mean(c * c, axis=-1, keepdims=True)
        y = c * lax.rsqrt(var + eps)
        o_ref[...] = (y * g_ref[...].astype(jnp.float32)
                      + beta_ref[...].astype(jnp.float32)).astype(o_ref.dtype)


def _ln_kernel(x_ref, g_ref, b_ref, o_ref, *, eps):
    """No-residual LayerNorm (embedding LN)."""
    x = x_ref[...].astype(jnp.float32)
    mean = jnp.mean(x, axis=-1, keepdims=True)
    c = x - mean
    var = jnp.mean(c * c, axis=-1, keepdims=True)
    y = c * lax.rsqrt(var + eps)
    o_ref[...] = (y * g_ref[...].astype(jnp.float32)
                  + b_ref[...].astype(jnp.float32)).astype(o_ref.dtype)


def _attn_outproj_ln_kernel(maskb_ref, qkv_ref, res_ref, wo_ref, bo_ref,
                            g_ref, beta_ref, o_ref, acc_ref, *, H, dh, eps):
    """One batch element: multi-head attention + output projection + residual + LN1.

    qkv block : (1, S, 3D) bf16 fused q|k|v (head split done here, in VMEM).
    res block : (1, S, D)  bf16 residual (layer input).
    wo        : (D, D)     bf16 output projection (resident in VMEM).
    maskb     : (1, 1, S)  f32 precomputed additive mask bias.
    """
    D = H * dh
    qkv = qkv_ref[0]                       # (S, 3D) bf16
    mask_bias = maskb_ref[0]               # (1, S)  f32
    acc_ref[...] = jnp.zeros_like(acc_ref)

    # TODO(synk): for long sequences, tile the KV axis (flash-style online softmax)
    # instead of materializing the full (S, S) score matrix per head.
    # TODO(synk): verify via pl.lower_as_mlir that dot_general(qh, kh, ((1,),(1,)))
    # does not emit an XLU transpose of kh; if it does, store the K third of wqkv
    # pre-transposed at init.
    for h in range(H):                     # static unroll; per-head data stays in VMEM
        qh = qkv[:, h * dh:(h + 1) * dh]                   # (S, dh) bf16 (Wq pre-scaled)
        kh = qkv[:, D + h * dh:D + (h + 1) * dh]           # (S, dh) bf16
        vh = qkv[:, 2 * D + h * dh:2 * D + (h + 1) * dh]   # (S, dh) bf16
        s = lax.dot_general(qh, kh, (((1,), (1,)), ((), ())),
                            preferred_element_type=jnp.float32)          # (S, S) f32
        s = s + mask_bias
        s = s - jnp.max(s, axis=-1, keepdims=True)
        # TODO(synk): on v6e/v7x a bf16 exp path (~2x EUP throughput) is possible;
        # kept f32 here for v5e portability and reference-tolerance safety.
        p = jnp.exp(s)
        p = p * pl.reciprocal(jnp.sum(p, axis=-1, keepdims=True), approx=True)
        ctx_h = jnp.dot(p.astype(vh.dtype), vh,
                        preferred_element_type=jnp.float32)              # (S, dh) f32
        # Fused output projection: accumulate ctx_h @ Wo[h] directly. No per-head
        # stores, no concatenate-driven spill, no (M, D) ctx HBM round trip.
        acc_ref[...] += jnp.dot(ctx_h.astype(jnp.bfloat16),
                                wo_ref[h * dh:(h + 1) * dh, :],
                                preferred_element_type=jnp.float32)

    # Epilogue: bias + residual + LayerNorm (all in f32, one lane-dense store).
    hid = (acc_ref[...] + bo_ref[...].astype(jnp.float32)
           + res_ref[0].astype(jnp.float32))
    mean = jnp.mean(hid, axis=-1, keepdims=True)
    c = hid - mean
    var = jnp.mean(c * c, axis=-1, keepdims=True)
    y = c * lax.rsqrt(var + eps)
    o_ref[0] = (y * g_ref[...].astype(jnp.float32)
                + beta_ref[...].astype(jnp.float32)).astype(o_ref.dtype)


# ----------------------------------------------------------------------------
# pallas_call wrappers
# ----------------------------------------------------------------------------
def matmul_bias(x, w, b, activation=None, out_dtype=jnp.bfloat16):
    M, K = x.shape
    N = w.shape[1]
    tm = _pick_tile(M, _TM_PREF, _SUBLANE)
    tn = _pick_tile(N, _TN_PREF, _LANE)
    tk = _pick_tile(K, _TK_PREF, _LANE)
    kernel = functools.partial(_mm_bias_kernel, activation=activation)
    out_sz = jnp.dtype(out_dtype).itemsize
    blk = tm * tk * 2 + tk * tn * 2 + tn * 4 + tm * tn * out_sz
    return pl.pallas_call(
        kernel,
        grid=(M // tm, N // tn, K // tk),
        in_specs=[
            pl.BlockSpec((tm, tk), lambda i, j, k: (i, k)),
            pl.BlockSpec((tk, tn), lambda i, j, k: (k, j)),
            pl.BlockSpec((1, tn), lambda i, j, k: (0, j)),
        ],
        out_specs=pl.BlockSpec((tm, tn), lambda i, j, k: (i, j)),
        out_shape=jax.ShapeDtypeStruct((M, N), out_dtype),
        scratch_shapes=[pltpu.VMEM((tm, tn), jnp.float32)],
        compiler_params=pltpu.CompilerParams(
            dimension_semantics=("parallel", "parallel", "arbitrary"),
            vmem_limit_bytes=_vmem_limit(blk, tm * tn * 4)),
    )(x.astype(jnp.bfloat16), w.astype(jnp.bfloat16),
      b.reshape(1, N).astype(jnp.float32))


def matmul_bias_add_ln(x, w, b, residual, gamma, beta,
                       eps=1e-12, out_dtype=jnp.bfloat16):
    """Matmul with fused bias + residual-add + LayerNorm epilogue (LN over full N)."""
    M, K = x.shape
    N = w.shape[1]           # LN axis — kept un-tiled so the epilogue sees all of N
    # tm capped at 512: keeps the (tm,N) f32 accumulator + blocks inside the v5e budget.
    tm = _pick_tile(M, 512, _SUBLANE)
    tk = _pick_tile(K, _TK_PREF, _LANE)
    kernel = functools.partial(_mm_bias_add_ln_kernel, eps=eps)
    out_sz = jnp.dtype(out_dtype).itemsize
    blk = tm * tk * 2 + tk * N * 2 + tm * N * 2 + 3 * N * 4 + tm * N * out_sz
    # TODO(synk): for hidden sizes >= 2048 on v7x (64 MiB VMEM), tile N and
    # accumulate per-row sum / sum-of-squares stats instead of the un-tiled-N epilogue.
    return pl.pallas_call(
        kernel,
        grid=(M // tm, K // tk),
        in_specs=[
            pl.BlockSpec((tm, tk), lambda i, k: (i, k)),
            pl.BlockSpec((tk, N), lambda i, k: (k, 0)),
            pl.BlockSpec((1, N), lambda i, k: (0, 0)),
            pl.BlockSpec((tm, N), lambda i, k: (i, 0)),
            pl.BlockSpec((1, N), lambda i, k: (0, 0)),
            pl.BlockSpec((1, N), lambda i, k: (0, 0)),
        ],
        out_specs=pl.BlockSpec((tm, N), lambda i, k: (i, 0)),
        out_shape=jax.ShapeDtypeStruct((M, N), out_dtype),
        scratch_shapes=[pltpu.VMEM((tm, N), jnp.float32)],
        compiler_params=pltpu.CompilerParams(
            dimension_semantics=("parallel", "arbitrary"),
            vmem_limit_bytes=_vmem_limit(blk, tm * N * 4)),
    )(x.astype(jnp.bfloat16), w.astype(jnp.bfloat16),
      b.reshape(1, N).astype(jnp.float32),
      residual.astype(jnp.bfloat16),
      gamma.reshape(1, N).astype(jnp.float32),
      beta.reshape(1, N).astype(jnp.float32))


def layernorm(x, gamma, beta, eps=1e-12, out_dtype=jnp.bfloat16):
    M, D = x.shape
    tm = _pick_tile(M, 1024, _SUBLANE)
    kernel = functools.partial(_ln_kernel, eps=eps)
    blk = tm * D * x.dtype.itemsize + 2 * D * 4 + tm * D * jnp.dtype(out_dtype).itemsize
    return pl.pallas_call(
        kernel,
        grid=(M // tm,),
        in_specs=[
            pl.BlockSpec((tm, D), lambda i: (i, 0)),
            pl.BlockSpec((1, D), lambda i: (0, 0)),
            pl.BlockSpec((1, D), lambda i: (0, 0)),
        ],
        out_specs=pl.BlockSpec((tm, D), lambda i: (i, 0)),
        out_shape=jax.ShapeDtypeStruct((M, D), out_dtype),
        compiler_params=pltpu.CompilerParams(
            dimension_semantics=("parallel",),
            vmem_limit_bytes=_vmem_limit(blk)),
    )(x, gamma.reshape(1, D).astype(jnp.float32),
      beta.reshape(1, D).astype(jnp.float32))


def attention_outproj_ln(qkv, x_res, mask_bias, wo, bo, gamma, beta,
                         B, H, S, dh, eps=1e-12, out_dtype=jnp.bfloat16):
    """Fused MHA + output projection + residual + LN1.

    qkv: (B*S, 3D) bf16 fused projections (Wq pre-scaled by 1/sqrt(dh)).
    x_res: (B*S, D) bf16 residual. mask_bias: (B,1,S) f32 additive bias.
    """
    D = H * dh
    qkv3 = qkv.reshape(B, S, 3 * D)        # free reshape, no transpose
    res3 = x_res.reshape(B, S, D)
    kernel = functools.partial(_attn_outproj_ln_kernel, H=H, dh=dh, eps=eps)
    out_sz = jnp.dtype(out_dtype).itemsize
    blk = (S * 3 * D * 2 + S * D * 2 + D * D * 2 + 3 * D * 4 + D * 4
           + S * 4 + S * D * out_sz)
    # TODO(synk): add a head/grid axis (hp heads per step with hp*dh = 128) to
    # improve v7x two-TensorCore load balance when B is small and to shrink the
    # per-step qkv block at long S.
    out = pl.pallas_call(
        kernel,
        grid=(B,),
        in_specs=[
            pl.BlockSpec((1, 1, S), lambda b: (b, 0, 0)),
            pl.BlockSpec((1, S, 3 * D), lambda b: (b, 0, 0)),
            pl.BlockSpec((1, S, D), lambda b: (b, 0, 0)),
            pl.BlockSpec((D, D), lambda b: (0, 0)),
            pl.BlockSpec((1, D), lambda b: (0, 0)),
            pl.BlockSpec((1, D), lambda b: (0, 0)),
            pl.BlockSpec((1, D), lambda b: (0, 0)),
        ],
        out_specs=pl.BlockSpec((1, S, D), lambda b: (b, 0, 0)),
        out_shape=jax.ShapeDtypeStruct((B, S, D), out_dtype),
        scratch_shapes=[pltpu.VMEM((S, D), jnp.float32)],
        compiler_params=pltpu.CompilerParams(
            dimension_semantics=("parallel",),
            vmem_limit_bytes=_vmem_limit(blk, S * D * 4 + 2 * S * S * 4)),
    )(mask_bias, qkv3, res3,
      wo.astype(jnp.bfloat16), bo.reshape(1, D).astype(jnp.float32),
      gamma.reshape(1, D).astype(jnp.float32),
      beta.reshape(1, D).astype(jnp.float32))
    return out.reshape(B * S, D)


# ----------------------------------------------------------------------------
# Deterministic parameter construction (synthetic "pretrained" BERT weights)
# ----------------------------------------------------------------------------
def init_params(key, vocab, max_pos, type_vocab, D, I, L, H):
    keys = iter(jax.random.split(key, 8 + L * 12))
    nrm = lambda shp: (0.02 * jax.random.normal(next(keys), shp)).astype(jnp.float32)
    zeros = lambda shp: jnp.zeros(shp, jnp.float32)
    ones = lambda shp: jnp.ones(shp, jnp.float32)
    scale = 1.0 / math.sqrt(D // H)        # folded into Wq/bq: no per-score scaling

    params = {
        "word_emb": nrm((vocab, D)),
        "pos_emb": nrm((max_pos, D)),
        "type_emb": nrm((type_vocab, D)),
        "emb_ln_g": ones((D,)),
        "emb_ln_b": zeros((D,)),
        "pool_w": nrm((D, D)),
        "pool_b": zeros((D,)),
        "layers": [],
    }
    for _ in range(L):
        wq, wk, wv = nrm((D, D)), nrm((D, D)), nrm((D, D))
        bq, bk, bv = zeros((D,)), zeros((D,)), zeros((D,))
        params["layers"].append({
            # fused QKV (D, 3D); 1/sqrt(dh) pre-folded into the Q third.
            "wqkv": jnp.concatenate([wq * scale, wk, wv], axis=1),
            "bqkv": jnp.concatenate([bq * scale, bk, bv]),
            "wo": nrm((D, D)), "bo": zeros((D,)),
            "ln1_g": ones((D,)), "ln1_b": zeros((D,)),
            "wi": nrm((D, I)), "bi": zeros((I,)),
            "wo2": nrm((I, D)), "bo2": zeros((D,)),
            "ln2_g": ones((D,)), "ln2_b": zeros((D,)),
        })
    return params


# ----------------------------------------------------------------------------
# SeqEncoder forward: (input_ids, attention_mask) -> (last_hidden, pooler_out)
# ----------------------------------------------------------------------------
def seq_encoder_forward(params, input_ids, attention_mask, *, H):
    B, S = input_ids.shape
    D = params["word_emb"].shape[1]
    dh = D // H
    M = B * S

    # --- embeddings (gather is plain-JAX glue; LN runs in a Pallas kernel) ---
    word = jnp.take(params["word_emb"], input_ids, axis=0)            # (B,S,D)
    pos = params["pos_emb"][:S][None, :, :]                           # (1,S,D)
    typ = params["type_emb"][0][None, None, :]                        # (1,1,D)
    emb = (word + pos + typ).reshape(M, D).astype(jnp.bfloat16)       # halve LN DMA
    x = layernorm(emb, params["emb_ln_g"], params["emb_ln_b"],
                  out_dtype=jnp.bfloat16)

    # additive attention-mask bias, computed once (kept in f32)
    mask_bias = ((1.0 - attention_mask.astype(jnp.float32))
                 * (-10000.0)).reshape(B, 1, S)

    # --- transformer layers ---------------------------------------------------
    n_layers = len(params["layers"])
    for li, lyr in enumerate(params["layers"]):
        qkv = matmul_bias(x, lyr["wqkv"], lyr["bqkv"])                 # (M, 3D) bf16
        # fused: attention + out-proj + residual + LN1 (no ctx HBM round trip)
        x = attention_outproj_ln(qkv, x, mask_bias, lyr["wo"], lyr["bo"],
                                 lyr["ln1_g"], lyr["ln1_b"], B, H, S, dh)

        inter = matmul_bias(x, lyr["wi"], lyr["bi"], activation="gelu")  # (M, I) bf16
        out_dt = jnp.float32 if li == n_layers - 1 else jnp.bfloat16
        x = matmul_bias_add_ln(inter, lyr["wo2"], lyr["bo2"], x,
                               lyr["ln2_g"], lyr["ln2_b"],
                               out_dtype=out_dt)                       # FFN out + LN2

    last_hidden_state = x.reshape(B, S, D)                             # f32

    # --- pooler: dense(tanh) on the [CLS] token -------------------------------
    cls = last_hidden_state[:, 0, :]                                   # (B, D)
    pooler_output = matmul_bias(cls, params["pool_w"], params["pool_b"],
                                activation="tanh", out_dtype=jnp.float32)
    return last_hidden_state, pooler_output


# ----------------------------------------------------------------------------
if __name__ == "__main__":
    # Small synthetic BERT config
    B, S, D, H, I, L = 2, 8, 32, 4, 64, 2
    VOCAB, MAX_POS, TYPE_VOCAB = 50, 16, 2

    key = jax.random.PRNGKey(0)
    k_param, k_ids = jax.random.split(key)

    params = init_params(k_param, VOCAB, MAX_POS, TYPE_VOCAB, D, I, L, H)

    input_ids = jax.random.randint(k_ids, (B, S), 0, VOCAB, dtype=jnp.int32)
    attention_mask = jnp.array(
        [[1, 1, 1, 1, 1, 1, 1, 1],
         [1, 1, 1, 1, 1, 1, 0, 0]], dtype=jnp.int32)

    fwd = jax.jit(functools.partial(seq_encoder_forward, H=H))
    last_hidden, pooled = fwd(params, input_ids, attention_mask)
    jax.block_until_ready((last_hidden, pooled))

    assert last_hidden.shape == (B, S, D)
    assert pooled.shape == (B, D)
    assert last_hidden.dtype == jnp.float32 and pooled.dtype == jnp.float32
    assert bool(jnp.all(jnp.isfinite(last_hidden))) and bool(jnp.all(jnp.isfinite(pooled)))
    print("KERNEL_OK")
</pallas_src>

<mosaic_0001>
module attributes {stable_mosaic.version = 11 : i64} {
  func.func @_ln_kernel(%arg0: i32, %arg1: memref<16x32xbf16, #tpu.memory_space<vmem>>, %arg2: memref<1x32xf32, #tpu.memory_space<vmem>>, %arg3: memref<1x32xf32, #tpu.memory_space<vmem>>, %arg4: memref<16x32xbf16, #tpu.memory_space<vmem>>) attributes {dimension_semantics = [#tpu.dimension_semantics<parallel>], iteration_bounds = array<i64: 1>, scalar_prefetch = 0 : i64, scratch_operands = 0 : i64, tpu.core_type = #tpu.core_type<tc>, window_params = [{transform_indices = @transform_0, window_bounds = array<i64: 16, 32>}, {pipeline_mode = #tpu.pipeline_mode<synchronous>, transform_indices = @transform_1, window_bounds = array<i64: 1, 32>}, {pipeline_mode = #tpu.pipeline_mode<synchronous>, transform_indices = @transform_2, window_bounds = array<i64: 1, 32>}, {transform_indices = @transform_3, window_bounds = array<i64: 16, 32>}]} {
    %c0 = arith.constant 0 : index
    %c0_0 = arith.constant 0 : index
    %0 = vector.load %arg1[%c0, %c0_0] : memref<16x32xbf16, #tpu.memory_space<vmem>>, vector<16x32xbf16>
    %1 = arith.extf %0 : vector<16x32xbf16> to vector<16x32xf32>
    %cst = arith.constant dense<0.000000e+00> : vector<16xf32>
    %2 = vector.multi_reduction <add>, %1, %cst [1] : vector<16x32xf32> to vector<16xf32>
    %3 = vector.shape_cast %2 : vector<16xf32> to vector<16x1xf32>
    %cst_1 = arith.constant 3.200000e+01 : f32
    %4 = vector.broadcast %cst_1 : f32 to vector<16x1xf32>
    %5 = arith.divf %3, %4 : vector<16x1xf32>
    %6 = vector.broadcast %5 : vector<16x1xf32> to vector<16x32xf32>
    %7 = arith.subf %1, %6 : vector<16x32xf32>
    %8 = arith.mulf %7, %7 : vector<16x32xf32>
    %cst_2 = arith.constant dense<0.000000e+00> : vector<16xf32>
    %9 = vector.multi_reduction <add>, %8, %cst_2 [1] : vector<16x32xf32> to vector<16xf32>
    %10 = vector.shape_cast %9 : vector<16xf32> to vector<16x1xf32>
    %cst_3 = arith.constant 3.200000e+01 : f32
    %11 = vector.broadcast %cst_3 : f32 to vector<16x1xf32>
    %12 = arith.divf %10, %11 : vector<16x1xf32>
    %cst_4 = arith.constant 9.99999996E-13 : f32
    %13 = vector.broadcast %cst_4 : f32 to vector<16x1xf32>
    %14 = arith.addf %12, %13 : vector<16x1xf32>
    %15 = math.rsqrt %14 : vector<16x1xf32>
    %16 = vector.broadcast %15 : vector<16x1xf32> to vector<16x32xf32>
    %17 = arith.mulf %7, %16 : vector<16x32xf32>
    %c0_5 = arith.constant 0 : index
    %c0_6 = arith.constant 0 : index
    %18 = vector.load %arg2[%c0_5, %c0_6] : memref<1x32xf32, #tpu.memory_space<vmem>>, vector<1x32xf32>
    %19 = vector.broadcast %18 : vector<1x32xf32> to vector<16x32xf32>
    %20 = arith.mulf %17, %19 : vector<16x32xf32>
    %c0_7 = arith.constant 0 : index
    %c0_8 = arith.constant 0 : index
    %21 = vector.load %arg3[%c0_7, %c0_8] : memref<1x32xf32, #tpu.memory_space<vmem>>, vector<1x32xf32>
    %22 = vector.broadcast %21 : vector<1x32xf32> to vector<16x32xf32>
    %23 = arith.addf %20, %22 : vector<16x32xf32>
    %24 = arith.truncf %23 : vector<16x32xf32> to vector<16x32xbf16>
    %c0_9 = arith.constant 0 : index
    %c0_10 = arith.constant 0 : index
    %25 = vector.load %arg4[%c0_9, %c0_10] : memref<16x32xbf16, #tpu.memory_space<vmem>>, vector<16x32xbf16>
    tpu.vector_store %arg4[%c0_9, %c0_10], %24 {strides = array<i32>} : memref<16x32xbf16, #tpu.memory_space<vmem>>, vector<16x32xbf16>,
    return
  }
  func.func @transform_0(%arg0: i32) -> (i32, i32) {
    %c0_i32 = arith.constant 0 : i32
    %c0_i32_0 = arith.constant 0 : i32
    return %arg0, %c0_i32 : i32, i32
  }
  func.func @transform_1(%arg0: i32) -> (i32, i32) {
    %c0_i32 = arith.constant 0 : i32
    %c0_i32_0 = arith.constant 0 : i32
    %c0_i32_1 = arith.constant 0 : i32
    return %c0_i32, %c0_i32_0 : i32, i32
  }
  func.func @transform_2(%arg0: i32) -> (i32, i32) {
    %c0_i32 = arith.constant 0 : i32
    %c0_i32_0 = arith.constant 0 : i32
    %c0_i32_1 = arith.constant 0 : i32
    return %c0_i32, %c0_i32_0 : i32, i32
  }
  func.func @transform_3(%arg0: i32) -> (i32, i32) {
    %c0_i32 = arith.constant 0 : i32
    %c0_i32_0 = arith.constant 0 : i32
    return %arg0, %c0_i32 : i32, i32
  }
}

module attributes {stable_mosaic.version = 11 : i64} {
  func.func @_mm_bias_kernel(%arg0: i32, %arg1: i32, %arg2: i32, %arg3: memref<16x32xbf16, #tpu.memory_space<vmem>>, %arg4: memref<32x96xbf16, #tpu.memory_space<vmem>>, %arg5: memref<1x96xf32, #tpu.memory_space<vmem>>, %arg6: memref<16x96xbf16, #tpu.memory_space<vmem>>, %arg7: memref<16x96xf32, #tpu.memory_space<vmem>>) attributes {dimension_semantics = [#tpu.dimension_semantics<parallel>, #tpu.dimension_semantics<parallel>, #tpu.dimension_semantics<arbitrary>], iteration_bounds = array<i64: 1, 1, 1>, scalar_prefetch = 0 : i64, scratch_operands = 1 : i64, tpu.core_type = #tpu.core_type<tc>, window_params = [{transform_indices = @transform_0, window_bounds = array<i64: 16, 32>}, {transform_indices = @transform_1, window_bounds = array<i64: 32, 96>}, {transform_indices = @transform_2, window_bounds = array<i64: 1, 96>}, {transform_indices = @transform_3, window_bounds = array<i64: 16, 96>}]} {
    %c0_i32 = arith.constant 0 : i32
    %0 = arith.cmpi eq, %arg2, %c0_i32 : i32
    %1 = arith.extui %0 : i1 to i32
    %c0_i32_0 = arith.constant 0 : i32
    %2 = arith.cmpi ne, %1, %c0_i32_0 : i32
    scf.if %2 {
      %cst_10 = arith.constant 0.000000e+00 : f32
      %12 = vector.broadcast %cst_10 : f32 to vector<16x96xf32>
      %c0_11 = arith.constant 0 : index
      %c0_12 = arith.constant 0 : index
      %13 = vector.load %arg7[%c0_11, %c0_12] : memref<16x96xf32, #tpu.memory_space<vmem>>, vector<16x96xf32>
      tpu.vector_store %arg7[%c0_11, %c0_12], %12 {strides = array<i32>} : memref<16x96xf32, #tpu.memory_space<vmem>>, vector<16x96xf32>,
    } else {
    }
    %c0 = arith.constant 0 : index
    %c0_1 = arith.constant 0 : index
    %3 = vector.load %arg7[%c0, %c0_1] : memref<16x96xf32, #tpu.memory_space<vmem>>, vector<16x96xf32>
    %c0_2 = arith.constant 0 : index
    %c0_3 = arith.constant 0 : index
    %4 = vector.load %arg3[%c0_2, %c0_3] : memref<16x32xbf16, #tpu.memory_space<vmem>>, vector<16x32xbf16>
    %c0_4 = arith.constant 0 : index
    %c0_5 = arith.constant 0 : index
    %5 = vector.load %arg4[%c0_4, %c0_5] : memref<32x96xbf16, #tpu.memory_space<vmem>>, vector<32x96xbf16>
    %cst = arith.constant dense<0.000000e+00> : vector<16x96xf32>
    %6 = tpu.matmul %4, %5, %cst {dimension_numbers = #tpu.dot_dimension_numbers<[1], [0], [0], [1], [0, 0, 1, 1], [], []>} : vector<16x32xbf16>, vector<32x96xbf16>, vector<16x96xf32> -> vector<16x96xf32>
    %7 = arith.addf %3, %6 : vector<16x96xf32>
    %c0_6 = arith.constant 0 : index
    %c0_7 = arith.constant 0 : index
    %8 = vector.load %arg7[%c0_6, %c0_7] : memref<16x96xf32, #tpu.memory_space<vmem>>, vector<16x96xf32>
    tpu.vector_store %arg7[%c0_6, %c0_7], %7 {strides = array<i32>} : memref<16x96xf32, #tpu.memory_space<vmem>>, vector<16x96xf32>,
    %c0_i32_8 = arith.constant 0 : i32
    %9 = arith.cmpi eq, %arg2, %c0_i32_8 : i32
    %10 = arith.extui %9 : i1 to i32
    %c0_i32_9 = arith.constant 0 : i32
    %11 = arith.cmpi ne, %10, %c0_i32_9 : i32
    scf.if %11 {
      %c0_10 = arith.constant 0 : index
      %c0_11 = arith.constant 0 : index
      %12 = vector.load %arg7[%c0_10, %c0_11] : memref<16x96xf32, #tpu.memory_space<vmem>>, vector<16x96xf32>
      %c0_12 = arith.constant 0 : index
      %c0_13 = arith.constant 0 : index
      %13 = vector.load %arg5[%c0_12, %c0_13] : memref<1x96xf32, #tpu.memory_space<vmem>>, vector<1x96xf32>
      %14 = vector.broadcast %13 : vector<1x96xf32> to vector<16x96xf32>
      %15 = arith.addf %12, %14 : vector<16x96xf32>
      %16 = arith.truncf %15 : vector<16x96xf32> to vector<16x96xbf16>
      %c0_14 = arith.constant 0 : index
      %c0_15 = arith.constant 0 : index
      %17 = vector.load %arg6[%c0_14, %c0_15] : memref<16x96xbf16, #tpu.memory_space<vmem>>, vector<16x96xbf16>
      tpu.vector_store %arg6[%c0_14, %c0_15], %16 {strides = array<i32>} : memref<16x96xbf16, #tpu.memory_space<vmem>>, vector<16x96xbf16>,
    } else {
    }
    return
  }
  func.func @transform_0(%arg0: i32, %arg1: i32, %arg2: i32) -> (i32, i32) {
    %c0_i32 = arith.constant 0 : i32
    return %arg0, %arg2 : i32, i32
  }
  func.func @transform_1(%arg0: i32, %arg1: i32, %arg2: i32) -> (i32, i32) {
    %c0_i32 = arith.constant 0 : i32
    return %arg2, %arg1 : i32, i32
  }
  func.func @transform_2(%arg0: i32, %arg1: i32, %arg2: i32) -> (i32, i32) {
    %c0_i32 = arith.constant 0 : i32
    %c0_i32_0 = arith.constant 0 : i32
    return %c0_i32, %arg1 : i32, i32
  }
  func.func @transform_3(%arg0: i32, %arg1: i32, %arg2: i32) -> (i32, i32) {
    %c0_i32 = arith.constant 0 : i32
    return %arg0, %arg1 : i32, i32
  }
}

module attributes {stable_mosaic.version = 11 : i64} {
  func.func @_attn_outproj_ln_kernel(%arg0: i32, %arg1: memref<1x1x8xf32, #tpu.memory_space<vmem>>, %arg2: memref<1x8x96xbf16, #tpu.memory_space<vmem>>, %arg3: memref<1x8x32xbf16, #tpu.memory_space<vmem>>, %arg4: memref<32x32xbf16, #tpu.memory_space<vmem>>, %arg5: memref<1x32xf32, #tpu.memory_space<vmem>>, %arg6: memref<1x32xf32, #tpu.memory_space<vmem>>, %arg7: memref<1x32xf32, #tpu.memory_space<vmem>>, %arg8: memref<1x8x32xbf16, #tpu.memory_space<vmem>>, %arg9: memref<8x32xf32, #tpu.memory_space<vmem>>) attributes {dimension_semantics = [#tpu.dimension_semantics<parallel>], iteration_bounds = array<i64: 2>, scalar_prefetch = 0 : i64, scratch_operands = 1 : i64, tpu.core_type = #tpu.core_type<tc>, window_params = [{transform_indices = @transform_0, window_bounds = array<i64: 1, 1, 8>}, {transform_indices = @transform_1, window_bounds = array<i64: 1, 8, 96>}, {transform_indices = @transform_2, window_bounds = array<i64: 1, 8, 32>}, {pipeline_mode = #tpu.pipeline_mode<synchronous>, transform_indices = @transform_3, window_bounds = array<i64: 32, 32>}, {pipeline_mode = #tpu.pipeline_mode<synchronous>, transform_indices = @transform_4, window_bounds = array<i64: 1, 32>}, {pipeline_mode = #tpu.pipeline_mode<synchronous>, transform_indices = @transform_5, window_bounds = array<i64: 1, 32>}, {pipeline_mode = #tpu.pipeline_mode<synchronous>, transform_indices = @transform_6, window_bounds = array<i64: 1, 32>}, {transform_indices = @transform_7, window_bounds = array<i64: 1, 8, 32>}]} {
    %c0 = arith.constant 0 : index
    %c0_0 = arith.constant 0 : index
    %c0_1 = arith.constant 0 : index
    %0 = vector.load %arg2[%c0, %c0_0, %c0_1] : memref<1x8x96xbf16, #tpu.memory_space<vmem>>, vector<1x8x96xbf16>
    %1 = vector.shape_cast %0 : vector<1x8x96xbf16> to vector<8x96xbf16>
    %c0_2 = arith.constant 0 : index
    %c0_3 = arith.constant 0 : index
    %c0_4 = arith.constant 0 : index
    %2 = vector.load %arg1[%c0_2, %c0_3, %c0_4] : memref<1x1x8xf32, #tpu.memory_space<vmem>>, vector<1x1x8xf32>
    %3 = vector.shape_cast %2 : vector<1x1x8xf32> to vector<1x8xf32>
    %cst = arith.constant 0.000000e+00 : f32
    %4 = vector.broadcast %cst : f32 to vector<8x32xf32>
    %c0_5 = arith.constant 0 : index
    %c0_6 = arith.constant 0 : index
    %5 = vector.load %arg9[%c0_5, %c0_6] : memref<8x32xf32, #tpu.memory_space<vmem>>, vector<8x32xf32>
    tpu.vector_store %arg9[%c0_5, %c0_6], %4 {strides = array<i32>} : memref<8x32xf32, #tpu.memory_space<vmem>>, vector<8x32xf32>,
    %6 = vector.extract_strided_slice %1 {offsets = [0, 0], sizes = [8, 8], strides = [1, 1]} : vector<8x96xbf16> to vector<8x8xbf16>
    %7 = vector.extract_strided_slice %1 {offsets = [0, 32], sizes = [8, 8], strides = [1, 1]} : vector<8x96xbf16> to vector<8x8xbf16>
    %8 = vector.extract_strided_slice %1 {offsets = [0, 64], sizes = [8, 8], strides = [1, 1]} : vector<8x96xbf16> to vector<8x8xbf16>
    %cst_7 = arith.constant dense<0.000000e+00> : vector<8x8xf32>
    %9 = tpu.matmul %6, %7, %cst_7 {dimension_numbers = #tpu.dot_dimension_numbers<[1], [1], [0], [0], [0, 0, 1, 0], [], []>} : vector<8x8xbf16>, vector<8x8xbf16>, vector<8x8xf32> -> vector<8x8xf32>
    %10 = vector.broadcast %3 : vector<1x8xf32> to vector<8x8xf32>
    %11 = arith.addf %9, %10 : vector<8x8xf32>
    %cst_8 = arith.constant dense<0xFF800000> : vector<8xf32>
    %12 = vector.multi_reduction <maximumf>, %11, %cst_8 [1] : vector<8x8xf32> to vector<8xf32>
    %13 = vector.shape_cast %12 : vector<8xf32> to vector<8x1xf32>
    %14 = vector.broadcast %13 : vector<8x1xf32> to vector<8x8xf32>
    %15 = arith.subf %11, %14 : vector<8x8xf32>
    %16 = math.exp %15 : vector<8x8xf32>
    %cst_9 = arith.constant dense<0.000000e+00> : vector<8xf32>
    %17 = vector.multi_reduction <add>, %16, %cst_9 [1] : vector<8x8xf32> to vector<8xf32>
    %18 = vector.shape_cast %17 : vector<8xf32> to vector<8x1xf32>
    %19 = tpu.reciprocal %18 {approx = true} : vector<8x1xf32> -> vector<8x1xf32>
    %20 = vector.broadcast %19 : vector<8x1xf32> to vector<8x8xf32>
    %21 = arith.mulf %16, %20 : vector<8x8xf32>
    %22 = arith.truncf %21 : vector<8x8xf32> to vector<8x8xbf16>
    %cst_10 = arith.constant dense<0.000000e+00> : vector<8x8xf32>
    %23 = tpu.matmul %22, %8, %cst_10 {dimension_numbers = #tpu.dot_dimension_numbers<[1], [0], [0], [1], [0, 0, 1, 1], [], []>} : vector<8x8xbf16>, vector<8x8xbf16>, vector<8x8xf32> -> vector<8x8xf32>
    %c0_11 = arith.constant 0 : index
    %c0_12 = arith.constant 0 : index
    %24 = vector.load %arg9[%c0_11, %c0_12] : memref<8x32xf32, #tpu.memory_space<vmem>>, vector<8x32xf32>
    %25 = arith.truncf %23 : vector<8x8xf32> to vector<8x8xbf16>
    %c0_13 = arith.constant 0 : index
    %c0_14 = arith.constant 0 : index
    %26 = vector.load %arg4[%c0_13, %c0_14] : memref<32x32xbf16, #tpu.memory_space<vmem>>, vector<8x32xbf16>
    %cst_15 = arith.constant dense<0.000000e+00> : vector<8x32xf32>
    %27 = tpu.matmul %25, %26, %cst_15 {dimension_numbers = #tpu.dot_dimension_numbers<[1], [0], [0], [1], [0, 0, 1, 1], [], []>} : vector<8x8xbf16>, vector<8x32xbf16>, vector<8x32xf32> -> vector<8x32xf32>
    %28 = arith.addf %24, %27 : vector<8x32xf32>
    %c0_16 = arith.constant 0 : index
    %c0_17 = arith.constant 0 : index
    %29 = vector.load %arg9[%c0_16, %c0_17] : memref<8x32xf32, #tpu.memory_space<vmem>>, vector<8x32xf32>
    tpu.vector_store %arg9[%c0_16, %c0_17], %28 {strides = array<i32>} : memref<8x32xf32, #tpu.memory_space<vmem>>, vector<8x32xf32>,
    %30 = vector.extract_strided_slice %1 {offsets = [0, 8], sizes = [8, 8], strides = [1, 1]} : vector<8x96xbf16> to vector<8x8xbf16>
    %31 = vector.extract_strided_slice %1 {offsets = [0, 40], sizes = [8, 8], strides = [1, 1]} : vector<8x96xbf16> to vector<8x8xbf16>
    %32 = vector.extract_strided_slice %1 {offsets = [0, 72], sizes = [8, 8], strides = [1, 1]} : vector<8x96xbf16> to vector<8x8xbf16>
    %cst_18 = arith.constant dense<0.000000e+00> : vector<8x8xf32>
    %33 = tpu.matmul %30, %31, %cst_18 {dimension_numbers = #tpu.dot_dimension_numbers<[1], [1], [0], [0], [0, 0, 1, 0], [], []>} : vector<8x8xbf16>, vector<8x8xbf16>, vector<8x8xf32> -> vector<8x8xf32>
    %34 = vector.broadcast %3 : vector<1x8xf32> to vector<8x8xf32>
    %35 = arith.addf %33, %34 : vector<8x8xf32>
    %cst_19 = arith.constant dense<0xFF800000> : vector<8xf32>
    %36 = vector.multi_reduction <maximumf>, %35, %cst_19 [1] : vector<8x8xf32> to vector<8xf32>
    %37 = vector.shape_cast %36 : vector<8xf32> to vector<8x1xf32>
    %38 = vector.broadcast %37 : vector<8x1xf32> to vector<8x8xf32>
    %39 = arith.subf %35, %38 : vector<8x8xf32>
    %40 = math.exp %39 : vector<8x8xf32>
    %cst_20 = arith.constant dense<0.000000e+00> : vector<8xf32>
    %41 = vector.multi_reduction <add>, %40, %cst_20 [1] : vector<8x8xf32> to vector<8xf32>
    %42 = vector.shape_cast %41 : vector<8xf32> to vector<8x1xf32>
    %43 = tpu.reciprocal %42 {approx = true} : vector<8x1xf32> -> vector<8x1xf32>
    %44 = vector.broadcast %43 : vector<8x1xf32> to vector<8x8xf32>
    %45 = arith.mulf %40, %44 : vector<8x8xf32>
    %46 = arith.truncf %45 : vector<8x8xf32> to vector<8x8xbf16>
    %cst_21 = arith.constant dense<0.000000e+00> : vector<8x8xf32>
    %47 = tpu.matmul %46, %32, %cst_21 {dimension_numbers = #tpu.dot_dimension_numbers<[1], [0], [0], [1], [0, 0, 1, 1], [], []>} : vector<8x8xbf16>, vector<8x8xbf16>, vector<8x8xf32> -> vector<8x8xf32>
    %c0_22 = arith.constant 0 : index
    %c0_23 = arith.constant 0 : index
    %48 = vector.load %arg9[%c0_22, %c0_23] : memref<8x32xf32, #tpu.memory_space<vmem>>, vector<8x32xf32>
    %49 = arith.truncf %47 : vector<8x8xf32> to vector<8x8xbf16>
    %c8 = arith.constant 8 : index
    %c0_24 = arith.constant 0 : index
    %50 = vector.load %arg4[%c8, %c0_24] : memref<32x32xbf16, #tpu.memory_space<vmem>>, vector<8x32xbf16>
    %cst_25 = arith.constant dense<0.000000e+00> : vector<8x32xf32>
    %51 = tpu.matmul %49, %50, %cst_25 {dimension_numbers = #tpu.dot_dimension_numbers<[1], [0], [0], [1], [0, 0, 1, 1], [], []>} : vector<8x8xbf16>, vector<8x32xbf16>, vector<8x32xf32> -> vector<8x32xf32>
    %52 = arith.addf %48, %51 : vector<8x32xf32>
    %c0_26 = arith.constant 0 : index
    %c0_27 = arith.constant 0 : index
    %53 = vector.load %arg9[%c0_26, %c0_27] : memref<8x32xf32, #tpu.memory_space<vmem>>, vector<8x32xf32>
    tpu.vector_store %arg9[%c0_26, %c0_27], %52 {strides = array<i32>} : memref<8x32xf32, #tpu.memory_space<vmem>>, vector<8x32xf32>,
    %54 = vector.extract_strided_slice %1 {offsets = [0, 16], sizes = [8, 8], strides = [1, 1]} : vector<8x96xbf16> to vector<8x8xbf16>
    %55 = vector.extract_strided_slice %1 {offsets = [0, 48], sizes = [8, 8], strides = [1, 1]} : vector<8x96xbf16> to vector<8x8xbf16>
    %56 = vector.extract_strided_slice %1 {offsets = [0, 80], sizes = [8, 8], strides = [1, 1]} : vector<8x96xbf16> to vector<8x8xbf16>
    %cst_28 = arith.constant dense<0.000000e+00> : vector<8x8xf32>
    %57 = tpu.matmul %54, %55, %cst_28 {dimension_numbers = #tpu.dot_dimension_numbers<[1], [1], [0], [0], [0, 0, 1, 0], [], []>} : vector<8x8xbf16>, vector<8x8xbf16>, vector<8x8xf32> -> vector<8x8xf32>
    %58 = vector.broadcast %3 : vector<1x8xf32> to vector<8x8xf32>
    %59 = arith.addf %57, %58 : vector<8x8xf32>
    %cst_29 = arith.constant dense<0xFF800000> : vector<8xf32>
    %60 = vector.multi_reduction <maximumf>, %59, %cst_29 [1] : vector<8x8xf32> to vector<8xf32>
    %61 = vector.shape_cast %60 : vector<8xf32> to vector<8x1xf32>
    %62 = vector.broadcast %61 : vector<8x1xf32> to vector<8x8xf32>
    %63 = arith.subf %59, %62 : vector<8x8xf32>
    %64 = math.exp %63 : vector<8x8xf32>
    %cst_30 = arith.constant dense<0.000000e+00> : vector<8xf32>
    %65 = vector.multi_reduction <add>, %64, %cst_30 [1] : vector<8x8xf32> to vector<8xf32>
    %66 = vector.shape_cast %65 : vector<8xf32> to vector<8x1xf32>
    %67 = tpu.reciprocal %66 {approx = true} : vector<8x1xf32> -> vector<8x1xf32>
    %68 = vector.broadcast %67 : vector<8x1xf32> to vector<8x8xf32>
    %69 = arith.mulf %64, %68 : vector<8x8xf32>
    %70 = arith.truncf %69 : vector<8x8xf32> to vector<8x8xbf16>
    %cst_31 = arith.constant dense<0.000000e+00> : vector<8x8xf32>
    %71 = tpu.matmul %70, %56, %cst_31 {dimension_numbers = #tpu.dot_dimension_numbers<[1], [0], [0], [1], [0, 0, 1, 1], [], []>} : vector<8x8xbf16>, vector<8x8xbf16>, vector<8x8xf32> -> vector<8x8xf32>
    %c0_32 = arith.constant 0 : index
    %c0_33 = arith.constant 0 : index
    %72 = vector.load %arg9[%c0_32, %c0_33] : memref<8x32xf32, #tpu.memory_space<vmem>>, vector<8x32xf32>
    %73 = arith.truncf %71 : vector<8x8xf32> to vector<8x8xbf16>
    %c16 = arith.constant 16 : index
    %c0_34 = arith.constant 0 : index
    %74 = vector.load %arg4[%c16, %c0_34] : memref<32x32xbf16, #tpu.memory_space<vmem>>, vector<8x32xbf16>
    %cst_35 = arith.constant dense<0.000000e+00> : vector<8x32xf32>
    %75 = tpu.matmul %73, %74, %cst_35 {dimension_numbers = #tpu.dot_dimension_numbers<[1], [0], [0], [1], [0, 0, 1, 1], [], []>} : vector<8x8xbf16>, vector<8x32xbf16>, vector<8x32xf32> -> vector<8x32xf32>
    %76 = arith.addf %72, %75 : vector<8x32xf32>
    %c0_36 = arith.constant 0 : index
    %c0_37 = arith.constant 0 : index
    %77 = vector.load %arg9[%c0_36, %c0_37] : memref<8x32xf32, #tpu.memory_space<vmem>>, vector<8x32xf32>
    tpu.vector_store %arg9[%c0_36, %c0_37], %76 {strides = array<i32>} : memref<8x32xf32, #tpu.memory_space<vmem>>, vector<8x32xf32>,
    %78 = vector.extract_strided_slice %1 {offsets = [0, 24], sizes = [8, 8], strides = [1, 1]} : vector<8x96xbf16> to vector<8x8xbf16>
    %79 = vector.extract_strided_slice %1 {offsets = [0, 56], sizes = [8, 8], strides = [1, 1]} : vector<8x96xbf16> to vector<8x8xbf16>
    %80 = vector.extract_strided_slice %1 {offsets = [0, 88], sizes = [8, 8], strides = [1, 1]} : vector<8x96xbf16> to vector<8x8xbf16>
    %cst_38 = arith.constant dense<0.000000e+00> : vector<8x8xf32>
    %81 = tpu.matmul %78, %79, %cst_38 {dimension_numbers = #tpu.dot_dimension_numbers<[1], [1], [0], [0], [0, 0, 1, 0], [], []>} : vector<8x8xbf16>, vector<8x8xbf16>, vector<8x8xf32> -> vector<8x8xf32>
    %82 = vector.broadcast %3 : vector<1x8xf32> to vector<8x8xf32>
    %83 = arith.addf %81, %82 : vector<8x8xf32>
    %cst_39 = arith.constant dense<0xFF800000> : vector<8xf32>
    %84 = vector.multi_reduction <maximumf>, %83, %cst_39 [1] : vector<8x8xf32> to vector<8xf32>
    %85 = vector.shape_cast %84 : vector<8xf32> to vector<8x1xf32>
    %86 = vector.broadcast %85 : vector<8x1xf32> to vector<8x8xf32>
    %87 = arith.subf %83, %86 : vector<8x8xf32>
    %88 = math.exp %87 : vector<8x8xf32>
    %cst_40 = arith.constant dense<0.000000e+00> : vector<8xf32>
    %89 = vector.multi_reduction <add>, %88, %cst_40 [1] : vector<8x8xf32> to vector<8xf32>
    %90 = vector.shape_cast %89 : vector<8xf32> to vector<8x1xf32>
    %91 = tpu.reciprocal %90 {approx = true} : vector<8x1xf32> -> vector<8x1xf32>
    %92 = vector.broadcast %91 : vector<8x1xf32> to vector<8x8xf32>
    %93 = arith.mulf %88, %92 : vector<8x8xf32>
    %94 = arith.truncf %93 : vector<8x8xf32> to vector<8x8xbf16>
    %cst_41 = arith.constant dense<0.000000e+00> : vector<8x8xf32>
    %95 = tpu.matmul %94, %80, %cst_41 {dimension_numbers = #tpu.dot_dimension_numbers<[1], [0], [0], [1], [0, 0, 1, 1], [], []>} : vector<8x8xbf16>, vector<8x8xbf16>, vector<8x8xf32> -> vector<8x8xf32>
    %c0_42 = arith.constant 0 : index
    %c0_43 = arith.constant 0 : index
    %96 = vector.load %arg9[%c0_42, %c0_43] : memref<8x32xf32, #tpu.memory_space<vmem>>, vector<8x32xf32>
    %97 = arith.truncf %95 : vector<8x8xf32> to vector<8x8xbf16>
    %c24 = arith.constant 24 : index
    %c0_44 = arith.constant 0 : index
    %98 = vector.load %arg4[%c24, %c0_44] : memref<32x32xbf16, #tpu.memory_space<vmem>>, vector<8x32xbf16>
    %cst_45 = arith.constant dense<0.000000e+00> : vector<8x32xf32>
    %99 = tpu.matmul %97, %98, %cst_45 {dimension_numbers = #tpu.dot_dimension_numbers<[1], [0], [0], [1], [0, 0, 1, 1], [], []>} : vector<8x8xbf16>, vector<8x32xbf16>, vector<8x32xf32> -> vector<8x32xf32>
    %100 = arith.addf %96, %99 : vector<8x32xf32>
    %c0_46 = arith.constant 0 : index
    %c0_47 = arith.constant 0 : index
    %101 = vector.load %arg9[%c0_46, %c0_47] : memref<8x32xf32, #tpu.memory_space<vmem>>, vector<8x32xf32>
    tpu.vector_store %arg9[%c0_46, %c0_47], %100 {strides = array<i32>} : memref<8x32xf32, #tpu.memory_space<vmem>>, vector<8x32xf32>,
    %c0_48 = arith.constant 0 : index
    %c0_49 = arith.constant 0 : index
    %102 = vector.load %arg9[%c0_48, %c0_49] : memref<8x32xf32, #tpu.memory_space<vmem>>, vector<8x32xf32>
    %c0_50 = arith.constant 0 : index
    %c0_51 = arith.constant 0 : index
    %103 = vector.load %arg5[%c0_50, %c0_51] : memref<1x32xf32, #tpu.memory_space<vmem>>, vector<1x32xf32>
    %104 = vector.broadcast %103 : vector<1x32xf32> to vector<8x32xf32>
    %105 = arith.addf %102, %104 : vector<8x32xf32>
    %c0_52 = arith.constant 0 : index
    %c0_53 = arith.constant 0 : index
    %c0_54 = arith.constant 0 : index
    %106 = vector.load %arg3[%c0_52, %c0_53, %c0_54] : memref<1x8x32xbf16, #tpu.memory_space<vmem>>, vector<1x8x32xbf16>
    %107 = vector.shape_cast %106 : vector<1x8x32xbf16> to vector<8x32xbf16>
    %108 = arith.extf %107 : vector<8x32xbf16> to vector<8x32xf32>
    %109 = arith.addf %105, %108 : vector<8x32xf32>
    %cst_55 = arith.constant dense<0.000000e+00> : vector<8xf32>
    %110 = vector.multi_reduction <add>, %109, %cst_55 [1] : vector<8x32xf32> to vector<8xf32>
    %111 = vector.shape_cast %110 : vector<8xf32> to vector<8x1xf32>
    %cst_56 = arith.constant 3.200000e+01 : f32
    %112 = vector.broadcast %cst_56 : f32 to vector<8x1xf32>
    %113 = arith.divf %111, %112 : vector<8x1xf32>
    %114 = vector.broadcast %113 : vector<8x1xf32> to vector<8x32xf32>
    %115 = arith.subf %109, %114 : vector<8x32xf32>
    %116 = arith.mulf %115, %115 : vector<8x32xf32>
    %cst_57 = arith.constant dense<0.000000e+00> : vector<8xf32>
    %117 = vector.multi_reduction <add>, %116, %cst_57 [1] : vector<8x32xf32> to vector<8xf32>
    %118 = vector.shape_cast %117 : vector<8xf32> to vector<8x1xf32>
    %cst_58 = arith.constant 3.200000e+01 : f32
    %119 = vector.broadcast %cst_58 : f32 to vector<8x1xf32>
    %120 = arith.divf %118, %119 : vector<8x1xf32>
    %cst_59 = arith.constant 9.99999996E-13 : f32
    %121 = vector.broadcast %cst_59 : f32 to vector<8x1xf32>
    %122 = arith.addf %120, %121 : vector<8x1xf32>
    %123 = math.rsqrt %122 : vector<8x1xf32>
    %124 = vector.broadcast %123 : vector<8x1xf32> to vector<8x32xf32>
    %125 = arith.mulf %115, %124 : vector<8x32xf32>
    %c0_60 = arith.constant 0 : index
    %c0_61 = arith.constant 0 : index
    %126 = vector.load %arg6[%c0_60, %c0_61] : memref<1x32xf32, #tpu.memory_space<vmem>>, vector<1x32xf32>
    %127 = vector.broadcast %126 : vector<1x32xf32> to vector<8x32xf32>
    %128 = arith.mulf %125, %127 : vector<8x32xf32>
    %c0_62 = arith.constant 0 : index
    %c0_63 = arith.constant 0 : index
    %129 = vector.load %arg7[%c0_62, %c0_63] : memref<1x32xf32, #tpu.memory_space<vmem>>, vector<1x32xf32>
    %130 = vector.broadcast %129 : vector<1x32xf32> to vector<8x32xf32>
    %131 = arith.addf %128, %130 : vector<8x32xf32>
    %132 = arith.truncf %131 : vector<8x32xf32> to vector<8x32xbf16>
    %c0_64 = arith.constant 0 : index
    %c0_65 = arith.constant 0 : index
    %c0_66 = arith.constant 0 : index
    %133 = vector.load %arg8[%c0_64, %c0_65, %c0_66] : memref<1x8x32xbf16, #tpu.memory_space<vmem>>, vector<1x8x32xbf16>
    %134 = vector.shape_cast %133 : vector<1x8x32xbf16> to vector<8x32xbf16>
    %135 = vector.shape_cast %132 : vector<8x32xbf16> to vector<1x8x32xbf16>
    tpu.vector_store %arg8[%c0_64, %c0_65, %c0_66], %135 {strides = array<i32>} : memref<1x8x32xbf16, #tpu.memory_space<vmem>>, vector<1x8x32xbf16>,
    return
  }
  func.func @transform_0(%arg0: i32) -> (i32, i32, i32) {
    %c0_i32 = arith.constant 0 : i32
    %c0_i32_0 = arith.constant 0 : i32
    %c0_i32_1 = arith.constant 0 : i32
    return %arg0, %c0_i32, %c0_i32_0 : i32, i32, i32
  }
  func.func @transform_1(%arg0: i32) -> (i32, i32, i32) {
    %c0_i32 = arith.constant 0 : i32
    %c0_i32_0 = arith.constant 0 : i32
    %c0_i32_1 = arith.constant 0 : i32
    return %arg0, %c0_i32, %c0_i32_0 : i32, i32, i32
  }
  func.func @transform_2(%arg0: i32) -> (i32, i32, i32) {
    %c0_i32 = arith.constant 0 : i32
    %c0_i32_0 = arith.constant 0 : i32
    %c0_i32_1 = arith.constant 0 : i32
    return %arg0, %c0_i32, %c0_i32_0 : i32, i32, i32
  }
  func.func @transform_3(%arg0: i32) -> (i32, i32) {
    %c0_i32 = arith.constant 0 : i32
    %c0_i32_0 = arith.constant 0 : i32
    %c0_i32_1 = arith.constant 0 : i32
    return %c0_i32, %c0_i32_0 : i32, i32
  }
  func.func @transform_4(%arg0: i32) -> (i32, i32) {
    %c0_i32 = arith.constant 0 : i32
    %c0_i32_0 = arith.constant 0 : i32
    %c0_i32_1 = arith.constant 0 : i32
    return %c0_i32, %c0_i32_0 : i32, i32
  }
  func.func @transform_5(%arg0: i32) -> (i32, i32) {
    %c0_i32 = arith.constant 0 : i32
    %c0_i32_0 = arith.constant 0 : i32
    %c0_i32_1 = arith.constant 0 : i32
    return %c0_i32, %c0_i32_0 : i32, i32
  }
  func.func @transform_6(%arg0: i32) -> (i32, i32) {
    %c0_i32 = arith.constant 0 : i32
    %c0_i32_0 = arith.constant 0 : i32
    %c0_i32_1 = arith.constant 0 : i32
    return %c0_i32, %c0_i32_0 : i32, i32
  }
  func.func @transform_7(%arg0: i32) -> (i32, i32, i32) {
    %c0_i32 = arith.constant 0 : i32
    %c0_i32_0 = arith.constant 0 : i32
    %c0_i32_1 = arith.constant 0 : i32
    return %arg0, %c0_i32, %c0_i32_0 : i32, i32, i32
  }
}

module attributes {stable_mosaic.version = 11 : i64} {
  func.func @_mm_bias_kernel(%arg0: i32, %arg1: i32, %arg2: i32, %arg3: memref<16x32xbf16, #tpu.memory_space<vmem>>, %arg4: memref<32x64xbf16, #tpu.memory_space<vmem>>, %arg5: memref<1x64xf32, #tpu.memory_space<vmem>>, %arg6: memref<16x64xbf16, #tpu.memory_space<vmem>>, %arg7: memref<16x64xf32, #tpu.memory_space<vmem>>) attributes {dimension_semantics = [#tpu.dimension_semantics<parallel>, #tpu.dimension_semantics<parallel>, #tpu.dimension_semantics<arbitrary>], iteration_bounds = array<i64: 1, 1, 1>, scalar_prefetch = 0 : i64, scratch_operands = 1 : i64, tpu.core_type = #tpu.core_type<tc>, window_params = [{transform_indices = @transform_0, window_bounds = array<i64: 16, 32>}, {transform_indices = @transform_1, window_bounds = array<i64: 32, 64>}, {transform_indices = @transform_2, window_bounds = array<i64: 1, 64>}, {transform_indices = @transform_3, window_bounds = array<i64: 16, 64>}]} {
    %c0_i32 = arith.constant 0 : i32
    %0 = arith.cmpi eq, %arg2, %c0_i32 : i32
    %1 = arith.extui %0 : i1 to i32
    %c0_i32_0 = arith.constant 0 : i32
    %2 = arith.cmpi ne, %1, %c0_i32_0 : i32
    scf.if %2 {
      %cst_10 = arith.constant 0.000000e+00 : f32
      %12 = vector.broadcast %cst_10 : f32 to vector<16x64xf32>
      %c0_11 = arith.constant 0 : index
      %c0_12 = arith.constant 0 : index
      %13 = vector.load %arg7[%c0_11, %c0_12] : memref<16x64xf32, #tpu.memory_space<vmem>>, vector<16x64xf32>
      tpu.vector_store %arg7[%c0_11, %c0_12], %12 {strides = array<i32>} : memref<16x64xf32, #tpu.memory_space<vmem>>, vector<16x64xf32>,
    } else {
    }
    %c0 = arith.constant 0 : index
    %c0_1 = arith.constant 0 : index
    %3 = vector.load %arg7[%c0, %c0_1] : memref<16x64xf32, #tpu.memory_space<vmem>>, vector<16x64xf32>
    %c0_2 = arith.constant 0 : index
    %c0_3 = arith.constant 0 : index
    %4 = vector.load %arg3[%c0_2, %c0_3] : memref<16x32xbf16, #tpu.memory_space<vmem>>, vector<16x32xbf16>
    %c0_4 = arith.constant 0 : index
    %c0_5 = arith.constant 0 : index
    %5 = vector.load %arg4[%c0_4, %c0_5] : memref<32x64xbf16, #tpu.memory_space<vmem>>, vector<32x64xbf16>
    %cst = arith.constant dense<0.000000e+00> : vector<16x64xf32>
    %6 = tpu.matmul %4, %5, %cst {dimension_numbers = #tpu.dot_dimension_numbers<[1], [0], [0], [1], [0, 0, 1, 1], [], []>} : vector<16x32xbf16>, vector<32x64xbf16>, vector<16x64xf32> -> vector<16x64xf32>
    %7 = arith.addf %3, %6 : vector<16x64xf32>
    %c0_6 = arith.constant 0 : index
    %c0_7 = arith.constant 0 : index
    %8 = vector.load %arg7[%c0_6, %c0_7] : memref<16x64xf32, #tpu.memory_space<vmem>>, vector<16x64xf32>
    tpu.vector_store %arg7[%c0_6, %c0_7], %7 {strides = array<i32>} : memref<16x64xf32, #tpu.memory_space<vmem>>, vector<16x64xf32>,
    %c0_i32_8 = arith.constant 0 : i32
    %9 = arith.cmpi eq, %arg2, %c0_i32_8 : i32
    %10 = arith.extui %9 : i1 to i32
    %c0_i32_9 = arith.constant 0 : i32
    %11 = arith.cmpi ne, %10, %c0_i32_9 : i32
    scf.if %11 {
      %c0_10 = arith.constant 0 : index
      %c0_11 = arith.constant 0 : index
      %12 = vector.load %arg7[%c0_10, %c0_11] : memref<16x64xf32, #tpu.memory_space<vmem>>, vector<16x64xf32>
      %c0_12 = arith.constant 0 : index
      %c0_13 = arith.constant 0 : index
      %13 = vector.load %arg5[%c0_12, %c0_13] : memref<1x64xf32, #tpu.memory_space<vmem>>, vector<1x64xf32>
      %14 = vector.broadcast %13 : vector<1x64xf32> to vector<16x64xf32>
      %15 = arith.addf %12, %14 : vector<16x64xf32>
      %cst_14 = arith.constant 5.000000e-01 : f32
      %16 = vector.broadcast %cst_14 : f32 to vector<16x64xf32>
      %17 = arith.mulf %16, %15 : vector<16x64xf32>
      %cst_15 = arith.constant 0.707106769 : f32
      %18 = vector.broadcast %cst_15 : f32 to vector<16x64xf32>
      %19 = arith.mulf %15, %18 : vector<16x64xf32>
      %20 = math.absf %19 : vector<16x64xf32>
      %cst_16 = arith.constant 0.327591091 : f32
      %21 = vector.broadcast %cst_16 : f32 to vector<16x64xf32>
      %22 = arith.mulf %21, %20 : vector<16x64xf32>
      %cst_17 = arith.constant 1.000000e+00 : f32
      %23 = vector.broadcast %cst_17 : f32 to vector<16x64xf32>
      %24 = arith.addf %23, %22 : vector<16x64xf32>
      %cst_18 = arith.constant 1.000000e+00 : f32
      %25 = vector.broadcast %cst_18 : f32 to vector<16x64xf32>
      %26 = arith.divf %25, %24 : vector<16x64xf32>
      %cst_19 = arith.constant 1.06140542 : f32
      %27 = vector.broadcast %cst_19 : f32 to vector<16x64xf32>
      %28 = arith.mulf %27, %26 : vector<16x64xf32>
      %cst_20 = arith.constant -1.45315206 : f32
      %29 = vector.broadcast %cst_20 : f32 to vector<16x64xf32>
      %30 = arith.addf %28, %29 : vector<16x64xf32>
      %31 = arith.mulf %30, %26 : vector<16x64xf32>
      %cst_21 = arith.constant 1.42141378 : f32
      %32 = vector.broadcast %cst_21 : f32 to vector<16x64xf32>
      %33 = arith.addf %31, %32 : vector<16x64xf32>
      %34 = arith.mulf %33, %26 : vector<16x64xf32>
      %cst_22 = arith.constant -0.284496725 : f32
      %35 = vector.broadcast %cst_22 : f32 to vector<16x64xf32>
      %36 = arith.addf %34, %35 : vector<16x64xf32>
      %37 = arith.mulf %36, %26 : vector<16x64xf32>
      %cst_23 = arith.constant 0.254829586 : f32
      %38 = vector.broadcast %cst_23 : f32 to vector<16x64xf32>
      %39 = arith.addf %37, %38 : vector<16x64xf32>
      %40 = arith.mulf %39, %26 : vector<16x64xf32>
      %cst_24 = arith.constant 0.000000e+00 : f32
      %41 = vector.broadcast %cst_24 : f32 to vector<16x64xf32>
      %42 = arith.subf %41, %20 : vector<16x64xf32>
      %43 = arith.mulf %42, %20 : vector<16x64xf32>
      %44 = math.exp %43 : vector<16x64xf32>
      %45 = arith.mulf %40, %44 : vector<16x64xf32>
      %cst_25 = arith.constant 1.000000e+00 : f32
      %46 = vector.broadcast %cst_25 : f32 to vector<16x64xf32>
      %47 = arith.subf %46, %45 : vector<16x64xf32>
      %cst_26 = arith.constant 0.000000e+00 : f32
      %48 = vector.broadcast %cst_26 : f32 to vector<16x64xf32>
      %49 = arith.cmpf oge, %19, %48 : vector<16x64xf32>
      %cst_27 = arith.constant 0.000000e+00 : f32
      %50 = vector.broadcast %cst_27 : f32 to vector<16x64xf32>
      %51 = arith.subf %50, %47 : vector<16x64xf32>
      %52 = arith.select %49, %47, %51 : vector<16x64xi1>, vector<16x64xf32>
      %cst_28 = arith.constant 1.000000e+00 : f32
      %53 = vector.broadcast %cst_28 : f32 to vector<16x64xf32>
      %54 = arith.addf %53, %52 : vector<16x64xf32>
      %55 = arith.mulf %17, %54 : vector<16x64xf32>
      %56 = arith.truncf %55 : vector<16x64xf32> to vector<16x64xbf16>
      %c0_29 = arith.constant 0 : index
      %c0_30 = arith.constant 0 : index
      %57 = vector.load %arg6[%c0_29, %c0_30] : memref<16x64xbf16, #tpu.memory_space<vmem>>, vector<16x64xbf16>
      tpu.vector_store %arg6[%c0_29, %c0_30], %56 {strides = array<i32>} : memref<16x64xbf16, #tpu.memory_space<vmem>>, vector<16x64xbf16>,
    } else {
    }
    return
  }
  func.func @transform_0(%arg0: i32, %arg1: i32, %arg2: i32) -> (i32, i32) {
    %c0_i32 = arith.constant 0 : i32
    return %arg0, %arg2 : i32, i32
  }
  func.func @transform_1(%arg0: i32, %arg1: i32, %arg2: i32) -> (i32, i32) {
    %c0_i32 = arith.constant 0 : i32
    return %arg2, %arg1 : i32, i32
  }
  func.func @transform_2(%arg0: i32, %arg1: i32, %arg2: i32) -> (i32, i32) {
    %c0_i32 = arith.constant 0 : i32
    %c0_i32_0 = arith.constant 0 : i32
    return %c0_i32, %arg1 : i32, i32
  }
  func.func @transform_3(%arg0: i32, %arg1: i32, %arg2: i32) -> (i32, i32) {
    %c0_i32 = arith.constant 0 : i32
    return %arg0, %arg1 : i32, i32
  }
}

module attributes {stable_mosaic.version = 11 : i64} {
  func.func @_mm_bias_add_ln_kernel(%arg0: i32, %arg1: i32, %arg2: memref<16x64xbf16, #tpu.memory_space<vmem>>, %arg3: memref<64x32xbf16, #tpu.memory_space<vmem>>, %arg4: memref<1x32xf32, #tpu.memory_space<vmem>>, %arg5: memref<16x32xbf16, #tpu.memory_space<vmem>>, %arg6: memref<1x32xf32, #tpu.memory_space<vmem>>, %arg7: memref<1x32xf32, #tpu.memory_space<vmem>>, %arg8: memref<16x32xf32, #tpu.memory_space<vmem>>, %arg9: memref<16x32xf32, #tpu.memory_space<vmem>>) attributes {dimension_semantics = [#tpu.dimension_semantics<parallel>, #tpu.dimension_semantics<arbitrary>], iteration_bounds = array<i64: 1, 1>, scalar_prefetch = 0 : i64, scratch_operands = 1 : i64, tpu.core_type = #tpu.core_type<tc>, window_params = [{transform_indices = @transform_0, window_bounds = array<i64: 16, 64>}, {transform_indices = @transform_1, window_bounds = array<i64: 64, 32>}, {pipeline_mode = #tpu.pipeline_mode<synchronous>, transform_indices = @transform_2, window_bounds = array<i64: 1, 32>}, {transform_indices = @transform_3, window_bounds = array<i64: 16, 32>}, {pipeline_mode = #tpu.pipeline_mode<synchronous>, transform_indices = @transform_4, window_bounds = array<i64: 1, 32>}, {pipeline_mode = #tpu.pipeline_mode<synchronous>, transform_indices = @transform_5, window_bounds = array<i64: 1, 32>}, {transform_indices = @transform_6, window_bounds = array<i64: 16, 32>}]} {
    %c0_i32 = arith.constant 0 : i32
    %0 = arith.cmpi eq, %arg1, %c0_i32 : i32
    %1 = arith.extui %0 : i1 to i32
    %c0_i32_0 = arith.constant 0 : i32
    %2 = arith.cmpi ne, %1, %c0_i32_0 : i32
    scf.if %2 {
      %cst_10 = arith.constant 0.000000e+00 : f32
      %12 = vector.broadcast %cst_10 : f32 to vector<16x32xf32>
      %c0_11 = arith.constant 0 : index
      %c0_12 = arith.constant 0 : index
      %13 = vector.load %arg9[%c0_11, %c0_12] : memref<16x32xf32, #tpu.memory_space<vmem>>, vector<16x32xf32>
      tpu.vector_store %arg9[%c0_11, %c0_12], %12 {strides = array<i32>} : memref<16x32xf32, #tpu.memory_space<vmem>>, vector<16x32xf32>,
    } else {
    }
    %c0 = arith.constant 0 : index
    %c0_1 = arith.constant 0 : index
    %3 = vector.load %arg9[%c0, %c0_1] : memref<16x32xf32, #tpu.memory_space<vmem>>, vector<16x32xf32>
    %c0_2 = arith.constant 0 : index
    %c0_3 = arith.constant 0 : index
    %4 = vector.load %arg2[%c0_2, %c0_3] : memref<16x64xbf16, #tpu.memory_space<vmem>>, vector<16x64xbf16>
    %c0_4 = arith.constant 0 : index
    %c0_5 = arith.constant 0 : index
    %5 = vector.load %arg3[%c0_4, %c0_5] : memref<64x32xbf16, #tpu.memory_space<vmem>>, vector<64x32xbf16>
    %cst = arith.constant dense<0.000000e+00> : vector<16x32xf32>
    %6 = tpu.matmul %4, %5, %cst {dimension_numbers = #tpu.dot_dimension_numbers<[1], [0], [0], [1], [0, 0, 1, 1], [], []>} : vector<16x64xbf16>, vector<64x32xbf16>, vector<16x32xf32> -> vector<16x32xf32>
    %7 = arith.addf %3, %6 : vector<16x32xf32>
    %c0_6 = arith.constant 0 : index
    %c0_7 = arith.constant 0 : index
    %8 = vector.load %arg9[%c0_6, %c0_7] : memref<16x32xf32, #tpu.memory_space<vmem>>, vector<16x32xf32>
    tpu.vector_store %arg9[%c0_6, %c0_7], %7 {strides = array<i32>} : memref<16x32xf32, #tpu.memory_space<vmem>>, vector<16x32xf32>,
    %c0_i32_8 = arith.constant 0 : i32
    %9 = arith.cmpi eq, %arg1, %c0_i32_8 : i32
    %10 = arith.extui %9 : i1 to i32
    %c0_i32_9 = arith.constant 0 : i32
    %11 = arith.cmpi ne, %10, %c0_i32_9 : i32
    scf.if %11 {
      %c0_10 = arith.constant 0 : index
      %c0_11 = arith.constant 0 : index
      %12 = vector.load %arg9[%c0_10, %c0_11] : memref<16x32xf32, #tpu.memory_space<vmem>>, vector<16x32xf32>
      %c0_12 = arith.constant 0 : index
      %c0_13 = arith.constant 0 : index
      %13 = vector.load %arg4[%c0_12, %c0_13] : memref<1x32xf32, #tpu.memory_space<vmem>>, vector<1x32xf32>
      %14 = vector.broadcast %13 : vector<1x32xf32> to vector<16x32xf32>
      %15 = arith.addf %12, %14 : vector<16x32xf32>
      %c0_14 = arith.constant 0 : index
      %c0_15 = arith.constant 0 : index
      %16 = vector.load %arg5[%c0_14, %c0_15] : memref<16x32xbf16, #tpu.memory_space<vmem>>, vector<16x32xbf16>
      %17 = arith.extf %16 : vector<16x32xbf16> to vector<16x32xf32>
      %18 = arith.addf %15, %17 : vector<16x32xf32>
      %cst_16 = arith.constant dense<0.000000e+00> : vector<16xf32>
      %19 = vector.multi_reduction <add>, %18, %cst_16 [1] : vector<16x32xf32> to vector<16xf32>
      %20 = vector.shape_cast %19 : vector<16xf32> to vector<16x1xf32>
      %cst_17 = arith.constant 3.200000e+01 : f32
      %21 = vector.broadcast %cst_17 : f32 to vector<16x1xf32>
      %22 = arith.divf %20, %21 : vector<16x1xf32>
      %23 = vector.broadcast %22 : vector<16x1xf32> to vector<16x32xf32>
      %24 = arith.subf %18, %23 : vector<16x32xf32>
      %25 = arith.mulf %24, %24 : vector<16x32xf32>
      %cst_18 = arith.constant dense<0.000000e+00> : vector<16xf32>
      %26 = vector.multi_reduction <add>, %25, %cst_18 [1] : vector<16x32xf32> to vector<16xf32>
      %27 = vector.shape_cast %26 : vector<16xf32> to vector<16x1xf32>
      %cst_19 = arith.constant 3.200000e+01 : f32
      %28 = vector.broadcast %cst_19 : f32 to vector<16x1xf32>
      %29 = arith.divf %27, %28 : vector<16x1xf32>
      %cst_20 = arith.constant 9.99999996E-13 : f32
      %30 = vector.broadcast %cst_20 : f32 to vector<16x1xf32>
      %31 = arith.addf %29, %30 : vector<16x1xf32>
      %32 = math.rsqrt %31 : vector<16x1xf32>
      %33 = vector.broadcast %32 : vector<16x1xf32> to vector<16x32xf32>
      %34 = arith.mulf %24, %33 : vector<16x32xf32>
      %c0_21 = arith.constant 0 : index
      %c0_22 = arith.constant 0 : index
      %35 = vector.load %arg6[%c0_21, %c0_22] : memref<1x32xf32, #tpu.memory_space<vmem>>, vector<1x32xf32>
      %36 = vector.broadcast %35 : vector<1x32xf32> to vector<16x32xf32>
      %37 = arith.mulf %34, %36 : vector<16x32xf32>
      %c0_23 = arith.constant 0 : index
      %c0_24 = arith.constant 0 : index
      %38 = vector.load %arg7[%c0_23, %c0_24] : memref<1x32xf32, #tpu.memory_space<vmem>>, vector<1x32xf32>
      %39 = vector.broadcast %38 : vector<1x32xf32> to vector<16x32xf32>
      %40 = arith.addf %37, %39 : vector<16x32xf32>
      %c0_25 = arith.constant 0 : index
      %c0_26 = arith.constant 0 : index
      %41 = vector.load %arg8[%c0_25, %c0_26] : memref<16x32xf32, #tpu.memory_space<vmem>>, vector<16x32xf32>
      tpu.vector_store %arg8[%c0_25, %c0_26], %40 {strides = array<i32>} : memref<16x32xf32, #tpu.memory_space<vmem>>, vector<16x32xf32>,
    } else {
    }
    return
  }
  func.func @transform_0(%arg0: i32, %arg1: i32) -> (i32, i32) {
    %c0_i32 = arith.constant 0 : i32
    return %arg0, %arg1 : i32, i32
  }
  func.func @transform_1(%arg0: i32, %arg1: i32) -> (i32, i32) {
    %c0_i32 = arith.constant 0 : i32
    %c0_i32_0 = arith.constant 0 : i32
    return %arg1, %c0_i32 : i32, i32
  }
  func.func @transform_2(%arg0: i32, %arg1: i32) -> (i32, i32) {
    %c0_i32 = arith.constant 0 : i32
    %c0_i32_0 = arith.constant 0 : i32
    %c0_i32_1 = arith.constant 0 : i32
    return %c0_i32, %c0_i32_0 : i32, i32
  }
  func.func @transform_3(%arg0: i32, %arg1: i32) -> (i32, i32) {
    %c0_i32 = arith.constant 0 : i32
    %c0_i32_0 = arith.constant 0 : i32
    return %arg0, %c0_i32 : i32, i32
  }
  func.func @transform_4(%arg0: i32, %arg1: i32) -> (i32, i32) {
    %c0_i32 = arith.constant 0 : i32
    %c0_i32_0 = arith.constant 0 : i32
    %c0_i32_1 = arith.constant 0 : i32
    return %c0_i32, %c0_i32_0 : i32, i32
  }
  func.func @transform_5(%arg0: i32, %arg1: i32) -> (i32, i32) {
    %c0_i32 = arith.constant 0 : i32
    %c0_i32_0 = arith.constant 0 : i32
    %c0_i32_1 = arith.constant 0 : i32
    return %c0_i32, %c0_i32_0 : i32, i32
  }
  func.func @transform_6(%arg0: i32, %arg1: i32) -> (i32, i32) {
    %c0_i32 = arith.constant 0 : i32
    %c0_i32_0 = arith.constant 0 : i32
    return %arg0, %c0_i32 : i32, i32
  }
}

module attributes {stable_mosaic.version = 11 : i64} {
  func.func @_mm_bias_add_ln_kernel(%arg0: i32, %arg1: i32, %arg2: memref<16x64xbf16, #tpu.memory_space<vmem>>, %arg3: memref<64x32xbf16, #tpu.memory_space<vmem>>, %arg4: memref<1x32xf32, #tpu.memory_space<vmem>>, %arg5: memref<16x32xbf16, #tpu.memory_space<vmem>>, %arg6: memref<1x32xf32, #tpu.memory_space<vmem>>, %arg7: memref<1x32xf32, #tpu.memory_space<vmem>>, %arg8: memref<16x32xbf16, #tpu.memory_space<vmem>>, %arg9: memref<16x32xf32, #tpu.memory_space<vmem>>) attributes {dimension_semantics = [#tpu.dimension_semantics<parallel>, #tpu.dimension_semantics<arbitrary>], iteration_bounds = array<i64: 1, 1>, scalar_prefetch = 0 : i64, scratch_operands = 1 : i64, tpu.core_type = #tpu.core_type<tc>, window_params = [{transform_indices = @transform_0, window_bounds = array<i64: 16, 64>}, {transform_indices = @transform_1, window_bounds = array<i64: 64, 32>}, {pipeline_mode = #tpu.pipeline_mode<synchronous>, transform_indices = @transform_2, window_bounds = array<i64: 1, 32>}, {transform_indices = @transform_3, window_bounds = array<i64: 16, 32>}, {pipeline_mode = #tpu.pipeline_mode<synchronous>, transform_indices = @transform_4, window_bounds = array<i64: 1, 32>}, {pipeline_mode = #tpu.pipeline_mode<synchronous>, transform_indices = @transform_5, window_bounds = array<i64: 1, 32>}, {transform_indices = @transform_6, window_bounds = array<i64: 16, 32>}]} {
    %c0_i32 = arith.constant 0 : i32
    %0 = arith.cmpi eq, %arg1, %c0_i32 : i32
    %1 = arith.extui %0 : i1 to i32
    %c0_i32_0 = arith.constant 0 : i32
    %2 = arith.cmpi ne, %1, %c0_i32_0 : i32
    scf.if %2 {
      %cst_10 = arith.constant 0.000000e+00 : f32
      %12 = vector.broadcast %cst_10 : f32 to vector<16x32xf32>
      %c0_11 = arith.constant 0 : index
      %c0_12 = arith.constant 0 : index
      %13 = vector.load %arg9[%c0_11, %c0_12] : memref<16x32xf32, #tpu.memory_space<vmem>>, vector<16x32xf32>
      tpu.vector_store %arg9[%c0_11, %c0_12], %12 {strides = array<i32>} : memref<16x32xf32, #tpu.memory_space<vmem>>, vector<16x32xf32>,
    } else {
    }
    %c0 = arith.constant 0 : index
    %c0_1 = arith.constant 0 : index
    %3 = vector.load %arg9[%c0, %c0_1] : memref<16x32xf32, #tpu.memory_space<vmem>>, vector<16x32xf32>
    %c0_2 = arith.constant 0 : index
    %c0_3 = arith.constant 0 : index
    %4 = vector.load %arg2[%c0_2, %c0_3] : memref<16x64xbf16, #tpu.memory_space<vmem>>, vector<16x64xbf16>
    %c0_4 = arith.constant 0 : index
    %c0_5 = arith.constant 0 : index
    %5 = vector.load %arg3[%c0_4, %c0_5] : memref<64x32xbf16, #tpu.memory_space<vmem>>, vector<64x32xbf16>
    %cst = arith.constant dense<0.000000e+00> : vector<16x32xf32>
    %6 = tpu.matmul %4, %5, %cst {dimension_numbers = #tpu.dot_dimension_numbers<[1], [0], [0], [1], [0, 0, 1, 1], [], []>} : vector<16x64xbf16>, vector<64x32xbf16>, vector<16x32xf32> -> vector<16x32xf32>
    %7 = arith.addf %3, %6 : vector<16x32xf32>
    %c0_6 = arith.constant 0 : index
    %c0_7 = arith.constant 0 : index
    %8 = vector.load %arg9[%c0_6, %c0_7] : memref<16x32xf32, #tpu.memory_space<vmem>>, vector<16x32xf32>
    tpu.vector_store %arg9[%c0_6, %c0_7], %7 {strides = array<i32>} : memref<16x32xf32, #tpu.memory_space<vmem>>, vector<16x32xf32>,
    %c0_i32_8 = arith.constant 0 : i32
    %9 = arith.cmpi eq, %arg1, %c0_i32_8 : i32
    %10 = arith.extui %9 : i1 to i32
    %c0_i32_9 = arith.constant 0 : i32
    %11 = arith.cmpi ne, %10, %c0_i32_9 : i32
    scf.if %11 {
      %c0_10 = arith.constant 0 : index
      %c0_11 = arith.constant 0 : index
      %12 = vector.load %arg9[%c0_10, %c0_11] : memref<16x32xf32, #tpu.memory_space<vmem>>, vector<16x32xf32>
      %c0_12 = arith.constant 0 : index
      %c0_13 = arith.constant 0 : index
      %13 = vector.load %arg4[%c0_12, %c0_13] : memref<1x32xf32, #tpu.memory_space<vmem>>, vector<1x32xf32>
      %14 = vector.broadcast %13 : vector<1x32xf32> to vector<16x32xf32>
      %15 = arith.addf %12, %14 : vector<16x32xf32>
      %c0_14 = arith.constant 0 : index
      %c0_15 = arith.constant 0 : index
      %16 = vector.load %arg5[%c0_14, %c0_15] : memref<16x32xbf16, #tpu.memory_space<vmem>>, vector<16x32xbf16>
      %17 = arith.extf %16 : vector<16x32xbf16> to vector<16x32xf32>
      %18 = arith.addf %15, %17 : vector<16x32xf32>
      %cst_16 = arith.constant dense<0.000000e+00> : vector<16xf32>
      %19 = vector.multi_reduction <add>, %18, %cst_16 [1] : vector<16x32xf32> to vector<16xf32>
      %20 = vector.shape_cast %19 : vector<16xf32> to vector<16x1xf32>
      %cst_17 = arith.constant 3.200000e+01 : f32
      %21 = vector.broadcast %cst_17 : f32 to vector<16x1xf32>
      %22 = arith.divf %20, %21 : vector<16x1xf32>
      %23 = vector.broadcast %22 : vector<16x1xf32> to vector<16x32xf32>
      %24 = arith.subf %18, %23 : vector<16x32xf32>
      %25 = arith.mulf %24, %24 : vector<16x32xf32>
      %cst_18 = arith.constant dense<0.000000e+00> : vector<16xf32>
      %26 = vector.multi_reduction <add>, %25, %cst_18 [1] : vector<16x32xf32> to vector<16xf32>
      %27 = vector.shape_cast %26 : vector<16xf32> to vector<16x1xf32>
      %cst_19 = arith.constant 3.200000e+01 : f32
      %28 = vector.broadcast %cst_19 : f32 to vector<16x1xf32>
      %29 = arith.divf %27, %28 : vector<16x1xf32>
      %cst_20 = arith.constant 9.99999996E-13 : f32
      %30 = vector.broadcast %cst_20 : f32 to vector<16x1xf32>
      %31 = arith.addf %29, %30 : vector<16x1xf32>
      %32 = math.rsqrt %31 : vector<16x1xf32>
      %33 = vector.broadcast %32 : vector<16x1xf32> to vector<16x32xf32>
      %34 = arith.mulf %24, %33 : vector<16x32xf32>
      %c0_21 = arith.constant 0 : index
      %c0_22 = arith.constant 0 : index
      %35 = vector.load %arg6[%c0_21, %c0_22] : memref<1x32xf32, #tpu.memory_space<vmem>>, vector<1x32xf32>
      %36 = vector.broadcast %35 : vector<1x32xf32> to vector<16x32xf32>
      %37 = arith.mulf %34, %36 : vector<16x32xf32>
      %c0_23 = arith.constant 0 : index
      %c0_24 = arith.constant 0 : index
      %38 = vector.load %arg7[%c0_23, %c0_24] : memref<1x32xf32, #tpu.memory_space<vmem>>, vector<1x32xf32>
      %39 = vector.broadcast %38 : vector<1x32xf32> to vector<16x32xf32>
      %40 = arith.addf %37, %39 : vector<16x32xf32>
      %41 = arith.truncf %40 : vector<16x32xf32> to vector<16x32xbf16>
      %c0_25 = arith.constant 0 : index
      %c0_26 = arith.constant 0 : index
      %42 = vector.load %arg8[%c0_25, %c0_26] : memref<16x32xbf16, #tpu.memory_space<vmem>>, vector<16x32xbf16>
      tpu.vector_store %arg8[%c0_25, %c0_26], %41 {strides = array<i32>} : memref<16x32xbf16, #tpu.memory_space<vmem>>, vector<16x32xbf16>,
    } else {
    }
    return
  }
  func.func @transform_0(%arg0: i32, %arg1: i32) -> (i32, i32) {
    %c0_i32 = arith.constant 0 : i32
    return %arg0, %arg1 : i32, i32
  }
  func.func @transform_1(%arg0: i32, %arg1: i32) -> (i32, i32) {
    %c0_i32 = arith.constant 0 : i32
    %c0_i32_0 = arith.constant 0 : i32
    return %arg1, %c0_i32 : i32, i32
  }
  func.func @transform_2(%arg0: i32, %arg1: i32) -> (i32, i32) {
    %c0_i32 = arith.constant 0 : i32
    %c0_i32_0 = arith.constant 0 : i32
    %c0_i32_1 = arith.constant 0 : i32
    return %c0_i32, %c0_i32_0 : i32, i32
  }
  func.func @transform_3(%arg0: i32, %arg1: i32) -> (i32, i32) {
    %c0_i32 = arith.constant 0 : i32
    %c0_i32_0 = arith.constant 0 : i32
    return %arg0, %c0_i32 : i32, i32
  }
  func.func @transform_4(%arg0: i32, %arg1: i32) -> (i32, i32) {
    %c0_i32 = arith.constant 0 : i32
    %c0_i32_0 = arith.constant 0 : i32
    %c0_i32_1 = arith.constant 0 : i32
    return %c0_i32, %c0_i32_0 : i32, i32
  }
  func.func @transform_5(%arg0: i32, %arg1: i32) -> (i32, i32) {
    %c0_i32 = arith.constant 0 : i32
    %c0_i32_0 = arith.constant 0 : i32
    %c0_i32_1 = arith.constant 0 : i32
    return %c0_i32, %c0_i32_0 : i32, i32
  }
  func.func @transform_6(%arg0: i32, %arg1: i32) -> (i32, i32) {
    %c0_i32 = arith.constant 0 : i32
    %c0_i32_0 = arith.constant 0 : i32
    return %arg0, %c0_i32 : i32, i32
  }
}

module attributes {stable_mosaic.version = 11 : i64} {
  func.func @_mm_bias_kernel(%arg0: i32, %arg1: i32, %arg2: i32, %arg3: memref<2x32xbf16, #tpu.memory_space<vmem>>, %arg4: memref<32x32xbf16, #tpu.memory_space<vmem>>, %arg5: memref<1x32xf32, #tpu.memory_space<vmem>>, %arg6: memref<2x32xf32, #tpu.memory_space<vmem>>, %arg7: memref<2x32xf32, #tpu.memory_space<vmem>>) attributes {dimension_semantics = [#tpu.dimension_semantics<parallel>, #tpu.dimension_semantics<parallel>, #tpu.dimension_semantics<arbitrary>], iteration_bounds = array<i64: 1, 1, 1>, scalar_prefetch = 0 : i64, scratch_operands = 1 : i64, tpu.core_type = #tpu.core_type<tc>, window_params = [{transform_indices = @transform_0, window_bounds = array<i64: 2, 32>}, {transform_indices = @transform_1, window_bounds = array<i64: 32, 32>}, {transform_indices = @transform_2, window_bounds = array<i64: 1, 32>}, {transform_indices = @transform_3, window_bounds = array<i64: 2, 32>}]} {
    %c0_i32 = arith.constant 0 : i32
    %0 = arith.cmpi eq, %arg2, %c0_i32 : i32
    %1 = arith.extui %0 : i1 to i32
    %c0_i32_0 = arith.constant 0 : i32
    %2 = arith.cmpi ne, %1, %c0_i32_0 : i32
    scf.if %2 {
      %cst_10 = arith.constant 0.000000e+00 : f32
      %12 = vector.broadcast %cst_10 : f32 to vector<2x32xf32>
      %c0_11 = arith.constant 0 : index
      %c0_12 = arith.constant 0 : index
      %13 = vector.load %arg7[%c0_11, %c0_12] : memref<2x32xf32, #tpu.memory_space<vmem>>, vector<2x32xf32>
      tpu.vector_store %arg7[%c0_11, %c0_12], %12 {strides = array<i32>} : memref<2x32xf32, #tpu.memory_space<vmem>>, vector<2x32xf32>,
    } else {
    }
    %c0 = arith.constant 0 : index
    %c0_1 = arith.constant 0 : index
    %3 = vector.load %arg7[%c0, %c0_1] : memref<2x32xf32, #tpu.memory_space<vmem>>, vector<2x32xf32>
    %c0_2 = arith.constant 0 : index
    %c0_3 = arith.constant 0 : index
    %4 = vector.load %arg3[%c0_2, %c0_3] : memref<2x32xbf16, #tpu.memory_space<vmem>>, vector<2x32xbf16>
    %c0_4 = arith.constant 0 : index
    %c0_5 = arith.constant 0 : index
    %5 = vector.load %arg4[%c0_4, %c0_5] : memref<32x32xbf16, #tpu.memory_space<vmem>>, vector<32x32xbf16>
    %cst = arith.constant dense<0.000000e+00> : vector<2x32xf32>
    %6 = tpu.matmul %4, %5, %cst {dimension_numbers = #tpu.dot_dimension_numbers<[1], [0], [0], [1], [0, 0, 1, 1], [], []>} : vector<2x32xbf16>, vector<32x32xbf16>, vector<2x32xf32> -> vector<2x32xf32>
    %7 = arith.addf %3, %6 : vector<2x32xf32>
    %c0_6 = arith.constant 0 : index
    %c0_7 = arith.constant 0 : index
    %8 = vector.load %arg7[%c0_6, %c0_7] : memref<2x32xf32, #tpu.memory_space<vmem>>, vector<2x32xf32>
    tpu.vector_store %arg7[%c0_6, %c0_7], %7 {strides = array<i32>} : memref<2x32xf32, #tpu.memory_space<vmem>>, vector<2x32xf32>,
    %c0_i32_8 = arith.constant 0 : i32
    %9 = arith.cmpi eq, %arg2, %c0_i32_8 : i32
    %10 = arith.extui %9 : i1 to i32
    %c0_i32_9 = arith.constant 0 : i32
    %11 = arith.cmpi ne, %10, %c0_i32_9 : i32
    scf.if %11 {
      %c0_10 = arith.constant 0 : index
      %c0_11 = arith.constant 0 : index
      %12 = vector.load %arg7[%c0_10, %c0_11] : memref<2x32xf32, #tpu.memory_space<vmem>>, vector<2x32xf32>
      %c0_12 = arith.constant 0 : index
      %c0_13 = arith.constant 0 : index
      %13 = vector.load %arg5[%c0_12, %c0_13] : memref<1x32xf32, #tpu.memory_space<vmem>>, vector<1x32xf32>
      %14 = vector.broadcast %13 : vector<1x32xf32> to vector<2x32xf32>
      %15 = arith.addf %12, %14 : vector<2x32xf32>
      %16 = math.tanh %15 : vector<2x32xf32>
      %c0_14 = arith.constant 0 : index
      %c0_15 = arith.constant 0 : index
      %17 = vector.load %arg6[%c0_14, %c0_15] : memref<2x32xf32, #tpu.memory_space<vmem>>, vector<2x32xf32>
      tpu.vector_store %arg6[%c0_14, %c0_15], %16 {strides = array<i32>} : memref<2x32xf32, #tpu.memory_space<vmem>>, vector<2x32xf32>,
    } else {
    }
    return
  }
  func.func @transform_0(%arg0: i32, %arg1: i32, %arg2: i32) -> (i32, i32) {
    %c0_i32 = arith.constant 0 : i32
    return %arg0, %arg2 : i32, i32
  }
  func.func @transform_1(%arg0: i32, %arg1: i32, %arg2: i32) -> (i32, i32) {
    %c0_i32 = arith.constant 0 : i32
    return %arg2, %arg1 : i32, i32
  }
  func.func @transform_2(%arg0: i32, %arg1: i32, %arg2: i32) -> (i32, i32) {
    %c0_i32 = arith.constant 0 : i32
    %c0_i32_0 = arith.constant 0 : i32
    return %c0_i32, %arg1 : i32, i32
  }
  func.func @transform_3(%arg0: i32, %arg1: i32, %arg2: i32) -> (i32, i32) {
    %c0_i32 = arith.constant 0 : i32
    return %arg0, %arg1 : i32, i32
  }
}

</mosaic_0001>

<bundles_post_ra>
// kernel: seq_encoder_forward.10
= control target key start
LH: loop header
LB: loop body
LE: loop exit
PB: predicated region body
PF: predicated region fallthrough
CT: control target
= control target key end

     0   :  { %vm18_vm0 = vcmask 261120   ;;  %vm72_vm1 = vcmask 257024   ;;  %s132_s0 = inlined_call_operand.vmem [shape: bf16[16,32], index: 0, kind: input, shape index: {}]   ;;  %s133_s1 = inlined_call_operand.vmem [shape: f32[1,32], index: 1, kind: input, shape index: {}]   ;;  %s134_s2 = inlined_call_operand.vmem [shape: f32[1,32], index: 2, kind: input, shape index: {}]   ;;  %s135_s3 = inlined_call_operand.vmem [shape: bf16[16,32], index: 3, kind: output, shape index: {}]  }
   0x1   :  { %v86_v0 = vld [vmem:[%s132_s0] sm:$0xff]  }
   0x2   :  { %v87_v1 = vunpack.c.l.bf16 %v86_v0  ;;  %v88_v2 = vunpack.c.h.bf16 %v86_v0  ;;  %v79_v22 = vld [vmem:[%s133_s1] ss:$0 sm:$0xff] }
   0x3   :  { %v80_v24 = vld [vmem:[%s134_s2] ss:$0 sm:$0xff] }
   0x4   :  { %v19_v3 = vsel %vm18_vm0, %v87_v1, 0.0  ;;  %v22_v4 = vsel %vm18_vm0, %v88_v2, 0.0 }
   0x5   :  { %20 = vadd.xlane.f32.xlu0 %v19_v3 }
   0x9   :  { %23 = vadd.xlane.f32.xlu0 %v22_v4 }
  0x92   :  { %v21_v5 = vpop.xlane.xlu0 %20 }
  0x93   :  { %v26_v6 = vmul.f32 0.03125, %v21_v5 }
  0x95   :  { %v28_v7 = vsub.f32 %v87_v1, %v26_v6 }
  0x96   :  { %v24_v8 = vpop.xlane.xlu0 %23 }
  0x97   :  { %v27_v9 = vmul.f32 0.03125, %v24_v8  ;;  %v30_v10 = vmul.f32 %v28_v7, %v28_v7 }
  0x99   :  { %v29_v11 = vsub.f32 %v88_v2, %v27_v9  ;;  %v32_v12 = vsel %vm18_vm0, %v30_v10, 0.0 }
  0x9a   :  { %33 = vadd.xlane.f32.xlu1 %v32_v12 }
  0x9b   :  { %v31_v13 = vmul.f32 %v29_v11, %v29_v11 }
  0x9d   :  { %v35_v14 = vsel %vm18_vm0, %v31_v13, 0.0 }
  0x9e   :  { %36 = vadd.xlane.f32.xlu1 %v35_v14 }
 0x127   :  { %v34_v15 = vpop.xlane.xlu1 %33 }
 0x128   :  { %v38_v16 = vmul.f32 0.03125, %v34_v15 }
 0x12a   :  { %v40_v17 = vadd.f32 1e-12, %v38_v16 }
 0x12b   :  { %v37_v18 = vpop.xlane.xlu1 %36 }
 0x12c   :  { %89 = vrsqrt.f32 %v40_v17  ;;  %v39_v19 = vmul.f32 0.03125, %v37_v18 }
 0x12e   :  { %v41_v20 = vadd.f32 1e-12, %v39_v19 }
 0x130   :  { %91 = vrsqrt.f32 %v41_v20 }
 0x136   :  { %v90_v21 = vpop.eup %89 }
 0x137   :  { %v44_v23 = vmul.f32 %v90_v21, %v28_v7 }
 0x139   :  { %v53_v25 = vmul.f32 %v79_v22, %v44_v23 }
 0x13a   :  { %v92_v26 = vpop.eup %91 }
 0x13b   :  { %v62_v27 = vadd.f32 %v80_v24, %v53_v25  ;;  %v45_v28 = vmul.f32 %v92_v26, %v29_v11 }
 0x13d   :  { %v83_v29 = vpack.c.bf16 %v62_v27, %v62_v27  ;;  %v54_v30 = vmul.f32 %v79_v22, %v45_v28 }
 0x13f   :  { %73 = vst.msk [vmem:[%s135_s3] sm:$0xf] %vm72_vm1, %v83_v29  ;;  %v63_v31 = vadd.f32 %v80_v24, %v54_v30 }
 0x141   :  { %v84_v32 = vpack.c.bf16 %v63_v31, %v63_v31 }
 0x143   :  { %74 = vst.msk [vmem:[%s135_s3 + $0x4] sm:$0xf] %vm72_vm1, %v84_v32 }

// kernel: seq_encoder_forward.11
= control target key start
LH: loop header
LB: loop body
LE: loop exit
PB: predicated region body
PF: predicated region fallthrough
CT: control target
= control target key end

     0   :  { %vm19_vm0 = vcmask 785408   ;;  %v151_v0 = vmov 0.0   ;;  %vm152_vm1 = vmmov 0   ;;  %vm47_vm2 = vcmask 261120   ;;  %s195_s1 = inlined_call_operand.vmem [shape: bf16[32,96], index: 1, kind: input, shape index: {}]   ;;  %s196_s0 = inlined_call_operand.vmem [shape: bf16[16,32], index: 0, kind: input, shape index: {}]   ;;  %s197_s2 = inlined_call_operand.vmem [shape: f32[1,96], index: 2, kind: input, shape index: {}]   ;;  %s198_s3 = inlined_call_operand.vmem [shape: bf16[16,96], index: 3, kind: output, shape index: {}]  }
   0x1   :  { %138 = vmatprep.subr.bf16.mxu0 %v151_v0  ;;  %v148_v1 = vld [vmem:[%s195_s1] sm:$0xff]   ;;  %142 = vmatprep.mubr.msk.bf16.mxu0 %vm152_vm1, %v151_v0  ;;  %20 = vst.msk [vmem:[#allocation2] sm:$0xff] %vm19_vm0, %v151_v0  ;;  %21 = vst.msk [vmem:[#allocation2 + $0x8] sm:$0xff] %vm19_vm0, %v151_v0  ;;  %v149_v2 = vld [vmem:[%s195_s1 + $0x8] sm:$0xff]   ;;  %vm119_vm3 = vcmask 781312  }
   0x2   :  { %139 = vmatpush3.bf16.msra.mxu0 %v148_v1  ;;  %v150_v3 = vld [vmem:[%s196_s0] sm:$0xff]  }
   0x3   :  { %140 = vmatprep.subr.bf16.mxu0 %v151_v0  ;;  %v130_v12 = vld [vmem:[%s197_s2] ss:$0 sm:$0xff] }
   0x6   :  { %141 = vmatpush3.bf16.msra.mxu0 %v149_v2 }
   0x8   :  { %v22_v4 = vld [vmem:[#allocation2] sm:$0xff]  ;;  %v23_v6 = vld [vmem:[#allocation2 + $0x8] sm:$0xff] }
   0x9   :  { %143 = vmatmul.mubr.msk.bf16.vlgmr.msra.gmra.mrb[0].mxu0 %vm47_vm2, %v150_v3 }
  0xdc   :  { %v85_v5 = vpop.f32.mrb[0].mxu0 }
  0xdd   :  { %v92_v7 = vadd.f32 %v85_v5, %v22_v4  ;;  %v144_v8 = vpop.f32.mrb[1].mxu0 }
  0xde   :  { %v88_v9 = vpop.f32.mrb[2].mxu0 }
  0xdf   :  { %95 = vst.msk [vmem:[#allocation2] sm:$0xff] %vm19_vm0, %v92_v7  ;;  %v93_v10 = vadd.f32 %v88_v9, %v23_v6  ;;  %v145_v11 = vpop.f32.mrb[3].mxu0 }
  0xe1   :  { %96 = vst.msk [vmem:[#allocation2 + $0x8] sm:$0xff] %vm19_vm0, %v93_v10 }
  0xe6   :  { %v100_v13 = vld [vmem:[#allocation2] sm:$0xff] }
  0xe7   :  { %v109_v14 = vadd.f32 %v130_v12, %v100_v13 }
  0xe8   :  { %v101_v15 = vld [vmem:[#allocation2 + $0x8] sm:$0xff] }
  0xe9   :  { %v133_v16 = vpack.c.bf16 %v109_v14, %v109_v14  ;;  %v110_v17 = vadd.f32 %v130_v12, %v101_v15 }
  0xeb   :  { %120 = vst.msk [vmem:[%s198_s3] sm:$0xf] %vm119_vm3, %v133_v16  ;;  %v134_v18 = vpack.c.bf16 %v110_v17, %v110_v17 }
  0xed   :  { %121 = vst.msk [vmem:[%s198_s3 + $0x4] sm:$0xf] %vm119_vm3, %v134_v18 }

// kernel: seq_encoder_forward.12
= control target key start
LH: loop header
LB: loop body
LE: loop exit
PB: predicated region body
PF: predicated region fallthrough
CT: control target
= control target key end

     0   :  { %s1306_s24 = smov 0   ;;  %s1450_s0 = inlined_call_operand.vmem [shape: f32[2,1,8], index: 0, kind: input, shape index: {}]   ;;  %s1451_s1 = inlined_call_operand.vmem [shape: bf16[2,8,96], index: 1, kind: input, shape index: {}]   ;;  %s1452_s2 = inlined_call_operand.vmem [shape: bf16[2,8,32], index: 2, kind: input, shape index: {}]   ;;  %s1453_s3 = inlined_call_operand.vmem [shape: bf16[32,32], index: 3, kind: input, shape index: {}]   ;;  %s1454_s4 = inlined_call_operand.vmem [shape: f32[1,32], index: 4, kind: input, shape index: {}]   ;;  %s1455_s5 = inlined_call_operand.vmem [shape: f32[1,32], index: 5, kind: input, shape index: {}]   ;;  %s1456_s6 = inlined_call_operand.vmem [shape: f32[1,32], index: 6, kind: input, shape index: {}]   ;;  %s1457_s7 = inlined_call_operand.vmem [shape: bf16[2,8,32], index: 7, kind: output, shape index: {}]  }
   0x1 LB: > { %s1082_s25 = sadd.s32 4294967295, %s1251_s24   ;;  %p1086_p0 = scmp.ge.s32.totalorder %s1251_s24, 1  ;;  %s1251_s24 = sphi %s1306_s24, %s17_s24  }
   0x2   : > { %p253_p1 = scmp.lt.s32.totalorder %s1251_s24, 3 }
   0x4   : > { %p254_p2 = pnand %p1086_p0, %p253_p1 }
   0x5   : > { %p290_p3 = scmp.lt.s32.totalorder (!%p254_p2), %s1082_s25, 1  ;;  %v1253_v0 = vmov (!%p254_p2), 0.0   ;;  %vm1254_vm0 = vmmov (!%p254_p2), 0   ;;  %s1255_s30 = smov (!%p254_p2), 96   ;;  %vm321_vm1 = vcmask (!%p254_p2), 64512   ;;  %vm385_vm2 = vcmask (!%p254_p2), 1043456  }
   0x6   : > { %257 = sbr.rel (%p254_p2) target bundleno = 2727 (0xaa7), region = 48  ;;  %1133 = vmatprep.subr.bf16.mxu0 (!%p254_p2), %v1253_v0  ;;  %1135 = vmatprep.mubr.msk.bf16.mxu0 (!%p254_p2), %vm1254_vm0, %v1253_v0  ;;  %s1256_s8 = smov (!%p254_p2), 120   ;;  %v431_v35 = vld [vmem:[%s1453_s3] sm:$0xf] (!%p254_p2)  ;;  %vm308_vm3 = vcmask (!%p254_p2), 261120   ;;  %vm1006_vm4 = vcmask (!%p254_p2), 257024  }
   0x7   : > { %1139 = vmatprep.subr.bf16.mxu1 (!%p254_p2), %v1253_v0  ;;  %1141 = vmatprep.mubr.msk.bf16.mxu1 (!%p254_p2), %vm1254_vm0, %v1253_v0  ;;  %s1257_s9 = smov (!%p254_p2), 88   ;;  %s1258_s13 = smov (!%p254_p2), 64   ;;  %v436_v38 = vsel (!%p254_p2), %vm385_vm2, %v431_v35, 0  ;;  %309 = vst.msk [vmem:[#allocation2] sm:$0xff] (!%p254_p2), %vm308_vm3, %v1253_v0  ;;  %v592_v53 = vld [vmem:[%s1453_s3 + $0x4] sm:$0xf] (!%p254_p2) }
   0x8   : > { %s1259_s14 = smov (!%p254_p2), 56   ;;  %s1260_s15 = smov (!%p254_p2), 80   ;;  %v597_v54 = vsel (!%p254_p2), %vm385_vm2, %v592_v53, 0 }
   0x9   : > { %s1261_s16 = smov (!%p254_p2), 112   ;;  %s1262_s21 = smov (!%p254_p2), 72  }
   0xa   : > { %s1263_s22 = smov (!%p254_p2), 104   ;;  %s1264_s23 = smov (!%p254_p2), 48  }
   0xb   : > { %s1265_s28 = smov (!%p254_p2), 40  }
   0xd   : > { %s1459_s25 = smov (!%p290_p3, %s1082_s25), 1 }
   0xe   : > { %s1320_s26 = sshll.u32 %s1459_s25, 2  ;;  %s292_s12 = scalar_lea.vmem %s1450_s0, %s1459_s25  ;;  %v429_v55 = vld [vmem:[#allocation2] sm:$0xff] }
   0xf   : > { %s296_s29 = scalar_lea.vmem %s1451_s1, %s1320_s26  ;;  %v1344_v8 = vld [vmem:[%s292_s12] ss:$0 sm:$0xff]  ;;  %s300_s10 = scalar_lea.vmem %s1452_s2, %s1320_s26 }
  0x10   : > { %v306_v1 = vld [vmem:[%s296_s29] sm:$0xf]  ;;  %s304_s19 = scalar_lea.vmem %s1457_s7, %s1320_s26 }
  0x11   : > { %v1326_v2 = vcombine.low %v306_v1, %v306_v1 }
  0x13   : > { %319 = vrot.lane.b32.xlu0 %v1326_v2, %s1255_s30  ;;  %480 = vrot.lane.b32.xlu1 %v1326_v2, %s1256_s8 }
  0x17   : > { %482 = vrot.lane.b32.xlu0 %v1326_v2, %s1257_s9 }
  0x85   : > { %v320_v3 = vpop.permute.xlu0 %319  ;;  %v481_v7 = vpop.permute.xlu1 %480 }
  0x86   : > { %v326_v4 = vsel %vm321_vm1, %v320_v3, 0 }
  0x87   : > { %1134 = vmatpush3.bf16.xpose.msra.mxu0 %v326_v4 }
  0x88   : > { %1151 = vmatprep.subr.bf16.mxu0 %v1253_v0 }
  0x89   : > { %v483_v5 = vpop.permute.xlu0 %482 }
  0x8a   : > { %v488_v6 = vsel %vm321_vm1, %v483_v5, 0 }
  0x8e   : > { %1136 = vmatmul.mubr.msk.bf16.vlgmr.msra.gmra.mrb[0].mxu0 %vm321_vm1, %v306_v1 }
  0x8f   : > { %1152 = vmatpush3.bf16.xpose.msra.mxu0 %v488_v6  ;;  %1153 = vmatprep.mubr.msk.bf16.mxu0 %vm1254_vm0, %v1253_v0 }
  0x90   : > { %1163 = vmatprep.subr.bf16.mxu0 %v1253_v0 }
  0x96   : > { %1154 = vmatmul.mubr.msk.bf16.vlgmr.msra.gmra.mrb[4].mxu0 %vm321_vm1, %v481_v7 }
  0x97   : > { %1165 = vmatprep.mubr.msk.bf16.mxu0 %vm1254_vm0, %v1253_v0  ;;  %1164 = vmatpush3.bf16.msra.mxu0 %v597_v54 }
  0x98   : > { %1175 = vmatprep.subr.bf16.mxu0 %v1253_v0 }
 0x161   : > { %v362_v9 = vpop.f32.mrb[0].mxu0 }
 0x162   : > { %v363_v10 = vadd.f32 %v1344_v8, %v362_v9  ;;  %v1137_v11 = vpop.f32.mrb[1].mxu0 }
 0x163   : > { %v365_v12 = vpop.f32.mrb[2].mxu0 }
 0x164   : > { %v1138_v13 = vpop.f32.mrb[3].mxu0  ;;  %v368_v14 = vsel %vm321_vm1, %v363_v10, -inf }
 0x165   : > { %369 = vmax.xlane.f32.xlu1 %v368_v14 }
 0x169   : > { %v524_v15 = vpop.f32.mrb[4].mxu0 }
 0x16a   : > { %v525_v16 = vadd.f32 %v1344_v8, %v524_v15  ;;  %v1155_v17 = vpop.f32.mrb[5].mxu0 }
 0x16b   : > { %v527_v18 = vpop.f32.mrb[6].mxu0 }
 0x16c   : > { %v530_v19 = vsel %vm321_vm1, %v525_v16, -inf  ;;  %v1156_v20 = vpop.f32.mrb[7].mxu0 }
 0x16d   : > { %531 = vmax.xlane.f32.xlu1 %v530_v19 }
 0x1f2   : > { %v370_v21 = vpop.xlane.xlu1 %369 }
 0x1f3   : > { %v371_v22 = vsub.f32 %v363_v10, %v370_v21 }
 0x1f5   : > { %v372_v23 = vmul.f32 1.442695, %v371_v22 }
 0x1f7   : > { %1227 = vpow2.f32 %v372_v23 }
 0x1fa   : > { %v532_v24 = vpop.xlane.xlu1 %531 }
 0x1fb   : > { %v533_v25 = vsub.f32 %v525_v16, %v532_v24 }
 0x1fd   : > { %v534_v26 = vmul.f32 1.442695, %v533_v25 }
 0x1ff   : > { %1229 = vpow2.f32 %v534_v26 }
 0x201   : > { %v1228_v27 = vpop.eup %1227 }
 0x202   : > { %v374_v28 = vsel %vm321_vm1, %v1228_v27, 0.0 }
 0x203   : > { %375 = vadd.xlane.f32.xlu0 %v374_v28 }
 0x209   : > { %v1230_v29 = vpop.eup %1229 }
 0x20a   : > { %v536_v30 = vsel %vm321_vm1, %v1230_v29, 0.0 }
 0x20b   : > { %537 = vadd.xlane.f32.xlu1 %v536_v30 }
 0x219   : > { %380 = vrot.lane.b32.xlu0 %v1326_v2, %s1258_s13 }
 0x21c   : > { %542 = vrot.lane.b32.xlu1 %v1326_v2, %s1259_s14 }
 0x21d   : > { %643 = vrot.lane.b32.xlu0 %v1326_v2, %s1260_s15 }
 0x221   : > { %641 = vrot.lane.b32.xlu0 %v1326_v2, %s1261_s16 }
 0x290   : > { %v376_v31 = vpop.xlane.xlu0 %375 }
 0x291   : > { %1231 = vrcp.f32 %v376_v31  ;;  %v753_v31 = vld [vmem:[%s1453_s3 + $0x8] sm:$0xf] }
 0x294   : > { %v381_v32 = vpop.permute.xlu0 %380 }
 0x295   : > { %v387_v33 = vsel %vm385_vm2, %v381_v32, 0  ;;  %v758_v32 = vsel %vm385_vm2, %v753_v31, 0 }
 0x296   : > { %1140 = vmatpush3.bf16.msra.mxu1 %v387_v33 }
 0x297   : > { %1145 = vmatprep.subr.bf16.mxu1 %v1253_v0 }
 0x298   : > { %v538_v39 = vpop.xlane.xlu1 %537  ;;  %v644_v49 = vpop.permute.xlu0 %643 }
 0x299   : > { %1233 = vrcp.f32 %v538_v39  ;;  %v649_v51 = vsel %vm321_vm1, %v644_v49, 0  ;;  %v914_v49 = vld [vmem:[%s1453_s3 + $0xc] sm:$0xf] }
 0x29b   : > { %v1232_v34 = vpop.eup %1231 }
 0x29c   : > { %v378_v36 = vmul.f32 %v1232_v34, %v1228_v27  ;;  %v543_v40 = vpop.permute.xlu1 %542  ;;  %v642_v52 = vpop.permute.xlu0 %641 }
 0x29d   : > { %v548_v44 = vsel %vm385_vm2, %v543_v40, 0 }
 0x29e   : > { %v379_v37 = vpack.c.bf16 %v378_v36, %v378_v36 }
 0x2a0   : > { %1142 = vmatmul.mubr.msk.bf16.vlgmr.msra.gmra.mrb[0].mxu1 %vm321_vm1, %v379_v37 }
 0x2a1   : > { %1146 = vmatpush3.bf16.msra.mxu1 %v436_v38  ;;  %1147 = vmatprep.mubr.msk.bf16.mxu1 %vm1254_vm0, %v1253_v0 }
 0x2a2   : > { %1157 = vmatprep.subr.bf16.mxu1 %v1253_v0 }
 0x2a3   : > { %v1234_v45 = vpop.eup %1233 }
 0x2a4   : > { %v540_v48 = vmul.f32 %v1234_v45, %v1230_v29 }
 0x2a6   : > { %v541_v50 = vpack.c.bf16 %v540_v48, %v540_v48 }
 0x373   : > { %v423_v41 = vpop.f32.mrb[0].mxu1 }
 0x374   : > { %v430_v42 = vpack.c.bf16 %v423_v41, %v423_v41  ;;  %v1143_v43 = vpop.f32.mrb[1].mxu1 }
 0x375   : > { %v426_v46 = vpop.f32.mrb[2].mxu1 }
 0x376   : > { %v1144_v47 = vpop.f32.mrb[3].mxu1  ;;  %1148 = vmatmul.mubr.msk.bf16.vlgmr.msra.gmra.mrb[4].mxu1 %vm321_vm1, %v430_v42 }
 0x377   : > { %1158 = vmatpush3.bf16.msra.mxu1 %v548_v44  ;;  %1159 = vmatprep.mubr.msk.bf16.mxu1 %vm1254_vm0, %v1253_v0 }
 0x378   : > { %1169 = vmatprep.subr.bf16.mxu1 %v1253_v0 }
 0x37e   : > { %1160 = vmatmul.mubr.msk.bf16.vlgmr.msra.gmra.mrb[8].mxu1 %vm321_vm1, %v541_v50  ;;  %v919_v50 = vsel %vm385_vm2, %v914_v49, 0 }
 0x37f   : > { %1171 = vmatprep.mubr.msk.bf16.mxu1 %vm1254_vm0, %v1253_v0 }
 0x380   : > { %1170 = vmatpush3.bf16.xpose.msra.mxu1 %v649_v51 }
 0x381   : > { %1181 = vmatprep.subr.bf16.mxu1 %v1253_v0 }
 0x387   : > { %1172 = vmatmul.mubr.msk.bf16.vlgmr.msra.gmra.mrb[12].mxu1 %vm321_vm1, %v642_v52 }
 0x388   : > { %1183 = vmatprep.mubr.msk.bf16.mxu1 %vm1254_vm0, %v1253_v0  ;;  %1182 = vmatpush3.bf16.msra.mxu1 %v758_v32 }
 0x389   : > { %1193 = vmatprep.subr.bf16.mxu1 %v1253_v0 }
 0x449   : > { %v472_v56 = vpop.f32.mrb[4].mxu1 }
 0x44a   : > { %v478_v57 = vadd.f32 %v472_v56, %v429_v55  ;;  %v1149_v58 = vpop.f32.mrb[5].mxu1 }
 0x44b   : > { %v475_v59 = vpop.f32.mrb[6].mxu1 }
 0x44c   : > { %479 = vst.msk [vmem:[#allocation2] sm:$0xff] %vm308_vm3, %v478_v57  ;;  %v1150_v60 = vpop.f32.mrb[7].mxu1 }
 0x451   : > { %v584_v61 = vpop.f32.mrb[8].mxu1 }
 0x452   : > { %v591_v62 = vpack.c.bf16 %v584_v61, %v584_v61  ;;  %v1161_v63 = vpop.f32.mrb[9].mxu1 }
 0x453   : > { %v587_v1 = vpop.f32.mrb[10].mxu1  ;;  %v590_v16 = vld [vmem:[#allocation2] sm:$0xff] }
 0x454   : > { %v1162_v3 = vpop.f32.mrb[11].mxu1  ;;  %1166 = vmatmul.mubr.msk.bf16.vlgmr.msra.gmra.mrb[8].mxu0 %vm321_vm1, %v591_v62 }
 0x455   : > { %1177 = vmatprep.mubr.msk.bf16.mxu0 %vm1254_vm0, %v1253_v0 }
 0x45a   : > { %v685_v4 = vpop.f32.mrb[12].mxu1 }
 0x45b   : > { %v686_v5 = vadd.f32 %v1344_v8, %v685_v4  ;;  %v1173_v6 = vpop.f32.mrb[13].mxu1 }
 0x45c   : > { %v688_v7 = vpop.f32.mrb[14].mxu1 }
 0x45d   : > { %v1174_v9 = vpop.f32.mrb[15].mxu1  ;;  %v691_v10 = vsel %vm321_vm1, %v686_v5, -inf }
 0x45e   : > { %692 = vmax.xlane.f32.xlu1 %v691_v10  ;;  %v972_v10 = vld [vmem:[%s300_s10] sm:$0xf] }
 0x46f   : > { %804 = vrot.lane.b32.xlu1 %v1326_v2, %s1262_s21 }
 0x473   : > { %802 = vrot.lane.b32.xlu1 %v1326_v2, %s1263_s22 }
 0x4eb   : > { %v693_v11 = vpop.xlane.xlu1 %692 }
 0x4ec   : > { %v694_v12 = vsub.f32 %v686_v5, %v693_v11  ;;  %v1104_v11 = vld [vmem:[%s1454_s4] ss:$0 sm:$0xff] }
 0x4ee   : > { %v695_v13 = vmul.f32 1.442695, %v694_v12  ;;  %v973_v12 = vunpack.c.l.bf16 %v972_v10 }
 0x4ef   : > { %v805_v26 = vpop.permute.xlu1 %804 }
 0x4f0   : > { %1235 = vpow2.f32 %v695_v13  ;;  %v810_v28 = vsel %vm321_vm1, %v805_v26, 0  ;;  %v1105_v26 = vld [vmem:[%s1455_s5] ss:$0 sm:$0xff] }
 0x4f3   : > { %v803_v30 = vpop.permute.xlu1 %802 }
 0x4fa   : > { %v1236_v14 = vpop.eup %1235 }
 0x4fb   : > { %v697_v15 = vsel %vm321_vm1, %v1236_v14, 0.0 }
 0x4fc   : > { %698 = vadd.xlane.f32.xlu0 %v697_v15 }
 0x512   : > { %703 = vrot.lane.b32.xlu0 %v1326_v2, %s1264_s23 }
 0x527   : > { %v633_v17 = vpop.f32.mrb[8].mxu0 }
 0x528   : > { %v639_v18 = vadd.f32 %v633_v17, %v590_v16  ;;  %v1167_v19 = vpop.f32.mrb[9].mxu0 }
 0x529   : > { %v636_v20 = vpop.f32.mrb[10].mxu0 }
 0x52a   : > { %640 = vst.msk [vmem:[#allocation2] sm:$0xff] %vm308_vm3, %v639_v18  ;;  %v1168_v21 = vpop.f32.mrb[11].mxu0 }
 0x589   : > { %v699_v22 = vpop.xlane.xlu0 %698 }
 0x58a   : > { %1237 = vrcp.f32 %v699_v22 }
 0x58d   : > { %v704_v23 = vpop.permute.xlu0 %703 }
 0x58e   : > { %v709_v24 = vsel %vm385_vm2, %v704_v23, 0 }
 0x58f   : > { %1176 = vmatpush3.bf16.msra.mxu0 %v709_v24 }
 0x590   : > { %1187 = vmatprep.subr.bf16.mxu0 %v1253_v0 }
 0x594   : > { %v1238_v25 = vpop.eup %1237 }
 0x595   : > { %v701_v27 = vmul.f32 %v1238_v25, %v1236_v14 }
 0x597   : > { %v702_v29 = vpack.c.bf16 %v701_v27, %v701_v27 }
 0x599   : > { %1178 = vmatmul.mubr.msk.bf16.vlgmr.msra.gmra.mrb[12].mxu0 %vm321_vm1, %v702_v29 }
 0x59a   : > { %1188 = vmatpush3.bf16.xpose.msra.mxu0 %v810_v28  ;;  %1189 = vmatprep.mubr.msk.bf16.mxu0 %vm1254_vm0, %v1253_v0  ;;  %v1106_v28 = vld [vmem:[%s1456_s6] ss:$0 sm:$0xff] }
 0x59b   : > { %1199 = vmatprep.subr.bf16.mxu0 %v1253_v0 }
 0x5a1   : > { %1190 = vmatmul.mubr.msk.bf16.vlgmr.msra.gmra.mrb[16].mxu0 %vm321_vm1, %v803_v30 }
 0x5a2   : > { %1201 = vmatprep.mubr.msk.bf16.mxu0 %vm1254_vm0, %v1253_v0  ;;  %1200 = vmatpush3.bf16.msra.mxu0 %v919_v50 }
 0x66c   : > { %v745_v33 = vpop.f32.mrb[12].mxu0 }
 0x66d   : > { %v752_v34 = vpack.c.bf16 %v745_v33, %v745_v33  ;;  %v1179_v35 = vpop.f32.mrb[13].mxu0 }
 0x66e   : > { %v748_v36 = vpop.f32.mrb[14].mxu0 }
 0x66f   : > { %v1180_v37 = vpop.f32.mrb[15].mxu0  ;;  %1184 = vmatmul.mubr.msk.bf16.vlgmr.msra.gmra.mrb[16].mxu1 %vm321_vm1, %v752_v34 }
 0x670   : > { %1195 = vmatprep.mubr.msk.bf16.mxu1 %vm1254_vm0, %v1253_v0 }
 0x674   : > { %v846_v38 = vpop.f32.mrb[16].mxu0 }
 0x675   : > { %v847_v39 = vadd.f32 %v1344_v8, %v846_v38  ;;  %v1191_v40 = vpop.f32.mrb[17].mxu0 }
 0x676   : > { %v849_v41 = vpop.f32.mrb[18].mxu0 }
 0x677   : > { %v1192_v42 = vpop.f32.mrb[19].mxu0  ;;  %v852_v43 = vsel %vm321_vm1, %v847_v39, -inf }
 0x678   : > { %853 = vmax.xlane.f32.xlu0 %v852_v43 }
 0x68e   : > { %864 = vrot.lane.b32.xlu0 %v1326_v2, %s1265_s28  ;;  %v751_v2 = vld [vmem:[#allocation2] sm:$0xff] }
 0x705   : > { %v854_v44 = vpop.xlane.xlu0 %853 }
 0x706   : > { %v855_v45 = vsub.f32 %v847_v39, %v854_v44 }
 0x708   : > { %v856_v46 = vmul.f32 1.442695, %v855_v45 }
 0x709   : > { %v865_v0 = vpop.permute.xlu0 %864 }
 0x70a   : > { %1239 = vpow2.f32 %v856_v46  ;;  %v870_v8 = vsel %vm385_vm2, %v865_v0, 0 }
 0x70b   : > { %1194 = vmatpush3.bf16.msra.mxu1 %v870_v8 }
 0x714   : > { %v1240_v47 = vpop.eup %1239 }
 0x715   : > { %v858_v48 = vsel %vm321_vm1, %v1240_v47, 0.0 }
 0x716   : > { %859 = vadd.xlane.f32.xlu1 %v858_v48 }
 0x742   : > { %v794_v51 = vpop.f32.mrb[16].mxu1 }
 0x743   : > { %v800_v52 = vadd.f32 %v794_v51, %v751_v2  ;;  %v1185_v53 = vpop.f32.mrb[17].mxu1 }
 0x744   : > { %v797_v54 = vpop.f32.mrb[18].mxu1 }
 0x745   : > { %801 = vst.msk [vmem:[#allocation2] sm:$0xff] %vm308_vm3, %v800_v52  ;;  %v1186_v55 = vpop.f32.mrb[19].mxu1 }
 0x74c   : > { %v912_v3 = vld [vmem:[#allocation2] sm:$0xff] }
 0x7a3   : > { %v860_v56 = vpop.xlane.xlu1 %859 }
 0x7a4   : > { %1241 = vrcp.f32 %v860_v56 }
 0x7ae   : > { %v1242_v57 = vpop.eup %1241 }
 0x7af   : > { %v862_v58 = vmul.f32 %v1242_v57, %v1240_v47 }
 0x7b1   : > { %v863_v59 = vpack.c.bf16 %v862_v58, %v862_v58 }
 0x7b3   : > { %1196 = vmatmul.mubr.msk.bf16.vlgmr.msra.gmra.mrb[20].mxu1 %vm321_vm1, %v863_v59 }
 0x886   : > { %v906_v60 = vpop.f32.mrb[20].mxu1 }
 0x887   : > { %v913_v61 = vpack.c.bf16 %v906_v60, %v906_v60  ;;  %v1197_v62 = vpop.f32.mrb[21].mxu1 }
 0x888   : > { %v909_v63 = vpop.f32.mrb[22].mxu1 }
 0x889   : > { %v1198_v1 = vpop.f32.mrb[23].mxu1  ;;  %1202 = vmatmul.mubr.msk.bf16.vlgmr.msra.gmra.mrb[20].mxu0 %vm321_vm1, %v913_v61 }
 0x95c   : > { %v955_v4 = vpop.f32.mrb[20].mxu0 }
 0x95d   : > { %v961_v5 = vadd.f32 %v955_v4, %v912_v3  ;;  %v1203_v6 = vpop.f32.mrb[21].mxu0 }
 0x95e   : > { %v958_v7 = vpop.f32.mrb[22].mxu0 }
 0x95f   : > { %962 = vst.msk [vmem:[#allocation2] sm:$0xff] %vm308_vm3, %v961_v5  ;;  %v1204_v9 = vpop.f32.mrb[23].mxu0 }
 0x966   : > { %v963_v13 = vld [vmem:[#allocation2] sm:$0xff] }
 0x967   : > { %v971_v14 = vadd.f32 %v1104_v11, %v963_v13 }
 0x969   : > { %v974_v15 = vadd.f32 %v973_v12, %v971_v14 }
 0x96b   : > { %v975_v16 = vsel %vm308_vm3, %v974_v15, 0.0 }
 0x96c   : > { %976 = vadd.xlane.f32.xlu1 %v975_v16 }
 0x9f9   : > { %v977_v17 = vpop.xlane.xlu1 %976 }
 0x9fa   : > { %v979_v18 = vmul.f32 0.03125, %v977_v17 }
 0x9fc   : > { %v980_v19 = vsub.f32 %v974_v15, %v979_v18 }
 0x9fe   : > { %v981_v20 = vmul.f32 %v980_v19, %v980_v19 }
 0xa00   : > { %v982_v21 = vsel %vm308_vm3, %v981_v20, 0.0 }
 0xa01   : > { %983 = vadd.xlane.f32.xlu1 %v982_v21 }
 0xa8e   : > { %v984_v22 = vpop.xlane.xlu1 %983 }
 0xa8f   : > { %v985_v23 = vmul.f32 0.03125, %v984_v22 }
 0xa91   : > { %v986_v24 = vadd.f32 1e-12, %v985_v23 }
 0xa93   : > { %1243 = vrsqrt.f32 %v986_v24 }
 0xa9d   : > { %v1244_v25 = vpop.eup %1243 }
 0xa9e   : > { %v988_v27 = vmul.f32 %v1244_v25, %v980_v19 }
 0xaa0   : > { %v996_v29 = vmul.f32 %v1105_v26, %v988_v27 }
 0xaa2   : > { %v1004_v30 = vadd.f32 %v1106_v28, %v996_v29 }
 0xaa4   : > { %v1005_v31 = vpack.c.bf16 %v1004_v30, %v1004_v30 }
 0xaa6   : > { %1007 = vst.msk [vmem:[%s304_s19] sm:$0xf] %vm1006_vm4, %v1005_v31 }
 0xaa7 PF: > { %s17_s24 = sadd.s32 1, %s1251_s24  }
 0xaa8   : > { %p14_p4 = scmp.ge.s32.totalorder %s17_s24, 4  }
 0xaaa   :  { %16 = sbr.rel (!%p14_p4) target bundleno = 1 (0x1), region = 84 }

// kernel: seq_encoder_forward.13
= control target key start
LH: loop header
LB: loop body
LE: loop exit
PB: predicated region body
PF: predicated region fallthrough
CT: control target
= control target key end

     0   :  { %vm19_vm0 = vcmask 523264   ;;  %v213_v0 = vmov 0.0   ;;  %vm214_vm1 = vmmov 0   ;;  %vm47_vm2 = vcmask 261120   ;;  %s257_s1 = inlined_call_operand.vmem [shape: bf16[32,64], index: 1, kind: input, shape index: {}]   ;;  %s258_s0 = inlined_call_operand.vmem [shape: bf16[16,32], index: 0, kind: input, shape index: {}]   ;;  %s259_s2 = inlined_call_operand.vmem [shape: f32[1,64], index: 2, kind: input, shape index: {}]   ;;  %s260_s3 = inlined_call_operand.vmem [shape: bf16[16,64], index: 3, kind: output, shape index: {}]  }
   0x1   :  { %192 = vmatprep.subr.bf16.mxu0 %v213_v0  ;;  %v202_v1 = vld [vmem:[%s257_s1] sm:$0xff]   ;;  %196 = vmatprep.mubr.msk.bf16.mxu0 %vm214_vm1, %v213_v0  ;;  %20 = vst.msk [vmem:[#allocation2] sm:$0xff] %vm19_vm0, %v213_v0  ;;  %21 = vst.msk [vmem:[#allocation2 + $0x8] sm:$0xff] %vm19_vm0, %v213_v0  ;;  %v203_v2 = vld [vmem:[%s257_s1 + $0x8] sm:$0xff]   ;;  %vm173_vm5 = vcmask 519168  }
   0x2   :  { %193 = vmatpush3.bf16.msra.mxu0 %v202_v1  ;;  %v204_v3 = vld [vmem:[%s258_s0] sm:$0xff]  }
   0x3   :  { %194 = vmatprep.subr.bf16.mxu0 %v213_v0  ;;  %v184_v12 = vld [vmem:[%s259_s2] ss:$0 sm:$0xff] }
   0x6   :  { %195 = vmatpush3.bf16.msra.mxu0 %v203_v2 }
   0x8   :  { %v22_v4 = vld [vmem:[#allocation2] sm:$0xff]  ;;  %v23_v6 = vld [vmem:[#allocation2 + $0x8] sm:$0xff] }
   0x9   :  { %197 = vmatmul.mubr.msk.bf16.vlgmr.msra.gmra.mrb[0].mxu0 %vm47_vm2, %v204_v3 }
  0xdc   :  { %v85_v5 = vpop.f32.mrb[0].mxu0 }
  0xdd   :  { %v92_v7 = vadd.f32 %v85_v5, %v22_v4  ;;  %v198_v8 = vpop.f32.mrb[1].mxu0 }
  0xde   :  { %v88_v9 = vpop.f32.mrb[2].mxu0 }
  0xdf   :  { %95 = vst.msk [vmem:[#allocation2] sm:$0xff] %vm19_vm0, %v92_v7  ;;  %v93_v10 = vadd.f32 %v88_v9, %v23_v6  ;;  %v199_v11 = vpop.f32.mrb[3].mxu0 }
  0xe1   :  { %96 = vst.msk [vmem:[#allocation2 + $0x8] sm:$0xff] %vm19_vm0, %v93_v10 }
  0xe6   :  { %v100_v13 = vld [vmem:[#allocation2] sm:$0xff] }
  0xe7   :  { %v109_v14 = vadd.f32 %v184_v12, %v100_v13 }
  0xe8   :  { %v101_v15 = vld [vmem:[#allocation2 + $0x8] sm:$0xff] }
  0xe9   :  { %v113_v16 = vmul.f32 0.70710677, %v109_v14  ;;  %v110_v17 = vadd.f32 %v184_v12, %v101_v15  ;;  %v111_v59 = vmul.f32 0.5, %v109_v14 }
  0xeb   :  { %v115_v18 = vand.u32 2147483647, %v113_v16  ;;  %v114_v19 = vmul.f32 0.70710677, %v110_v17  ;;  %vm155_vm3 = vcmp.ge.f32.partialorder %v113_v16, 0.0  ;;  %v112_v0 = vmul.f32 0.5, %v110_v17 }
  0xed   :  { %v117_v20 = vmul.f32 0.3275911, %v115_v18  ;;  %v116_v21 = vand.u32 2147483647, %v114_v19  ;;  %v143_v25 = vsub.f32 0.0, %v115_v18  ;;  %vm156_vm4 = vcmp.ge.f32.partialorder %v114_v19, 0.0 }
  0xef   :  { %v119_v22 = vadd.f32 1.0, %v117_v20  ;;  %v118_v23 = vmul.f32 0.3275911, %v116_v21  ;;  %v144_v26 = vsub.f32 0.0, %v116_v21  ;;  %v145_v28 = vmul.f32 %v143_v25, %v115_v18 }
  0xf1   :  { %205 = vrcp.f32 %v119_v22  ;;  %v120_v24 = vadd.f32 1.0, %v118_v23  ;;  %v146_v32 = vmul.f32 %v144_v26, %v116_v21  ;;  %v147_v33 = vmul.f32 1.442695, %v145_v28 }
  0xf3   :  { %207 = vrcp.f32 %v120_v24  ;;  %v149_v38 = vmul.f32 1.442695, %v146_v32 }
  0xf4   :  { %209 = vpow2.f32 %v147_v33 }
  0xf5   :  { %211 = vpow2.f32 %v149_v38 }
  0xfb   :  { %v206_v27 = vpop.eup %205 }
  0xfc   :  { %v125_v29 = vmul.f32 1.0614054, %v206_v27 }
  0xfd   :  { %v208_v30 = vpop.eup %207 }
  0xfe   :  { %v127_v31 = vadd.f32 -1.4531521, %v125_v29  ;;  %v126_v34 = vmul.f32 1.0614054, %v208_v30  ;;  %v210_v49 = vpop.eup %209 }
  0xff   :  { %v212_v53 = vpop.eup %211 }
 0x100   :  { %v129_v35 = vmul.f32 %v206_v27, %v127_v31  ;;  %v128_v36 = vadd.f32 -1.4531521, %v126_v34 }
 0x102   :  { %v131_v37 = vadd.f32 1.4214138, %v129_v35  ;;  %v130_v39 = vmul.f32 %v208_v30, %v128_v36 }
 0x104   :  { %v133_v40 = vmul.f32 %v206_v27, %v131_v37  ;;  %v132_v41 = vadd.f32 1.4214138, %v130_v39 }
 0x106   :  { %v135_v42 = vadd.f32 -0.28449672, %v133_v40  ;;  %v134_v43 = vmul.f32 %v208_v30, %v132_v41 }
 0x108   :  { %v137_v44 = vmul.f32 %v206_v27, %v135_v42  ;;  %v136_v45 = vadd.f32 -0.28449672, %v134_v43 }
 0x10a   :  { %v139_v46 = vadd.f32 0.2548296, %v137_v44  ;;  %v138_v47 = vmul.f32 %v208_v30, %v136_v45 }
 0x10c   :  { %v141_v48 = vmul.f32 %v206_v27, %v139_v46  ;;  %v140_v50 = vadd.f32 0.2548296, %v138_v47 }
 0x10e   :  { %v151_v51 = vmul.f32 %v210_v49, %v141_v48  ;;  %v142_v52 = vmul.f32 %v208_v30, %v140_v50 }
 0x110   :  { %v153_v54 = vsub.f32 1.0, %v151_v51  ;;  %v152_v55 = vmul.f32 %v212_v53, %v142_v52 }
 0x112   :  { %v157_v56 = vsub.f32 0.0, %v153_v54  ;;  %v154_v57 = vsub.f32 1.0, %v152_v55 }
 0x114   :  { %v159_v58 = vsel %vm155_vm3, %v153_v54, %v157_v56  ;;  %v158_v61 = vsub.f32 0.0, %v154_v57 }
 0x115   :  { %v161_v60 = vadd.f32 1.0, %v159_v58 }
 0x116   :  { %v160_v63 = vsel %vm156_vm4, %v154_v57, %v158_v61 }
 0x117   :  { %v163_v62 = vmul.f32 %v161_v60, %v111_v59  ;;  %v162_v1 = vadd.f32 1.0, %v160_v63 }
 0x119   :  { %v187_v2 = vpack.c.bf16 %v163_v62, %v163_v62  ;;  %v164_v3 = vmul.f32 %v162_v1, %v112_v0 }
 0x11b   :  { %174 = vst.msk [vmem:[%s260_s3] sm:$0xf] %vm173_vm5, %v187_v2  ;;  %v188_v4 = vpack.c.bf16 %v164_v3, %v164_v3 }
 0x11d   :  { %175 = vst.msk [vmem:[%s260_s3 + $0x4] sm:$0xf] %vm173_vm5, %v188_v4 }

// kernel: seq_encoder_forward.18
= control target key start
LH: loop header
LB: loop body
LE: loop exit
PB: predicated region body
PF: predicated region fallthrough
CT: control target
= control target key end

     0   :  { %vm28_vm0 = vcmask 261120   ;;  %v234_v0 = vmov 0.0   ;;  %vm235_vm1 = vmmov 0   ;;  %vm72_vm2 = vcmask 523264   ;;  %s314_s1 = inlined_call_operand.vmem [shape: bf16[64,32], index: 1, kind: input, shape index: {}]   ;;  %s315_s0 = inlined_call_operand.vmem [shape: bf16[16,64], index: 0, kind: input, shape index: {}]   ;;  %s316_s3 = inlined_call_operand.vmem [shape: bf16[16,32], index: 3, kind: input, shape index: {}]   ;;  %s317_s2 = inlined_call_operand.vmem [shape: f32[1,32], index: 2, kind: input, shape index: {}]   ;;  %s318_s4 = inlined_call_operand.vmem [shape: f32[1,32], index: 4, kind: input, shape index: {}]   ;;  %s319_s5 = inlined_call_operand.vmem [shape: f32[1,32], index: 5, kind: input, shape index: {}]   ;;  %s320_s6 = inlined_call_operand.vmem [shape: f32[16,32], index: 6, kind: output, shape index: {}]  }
   0x1   :  { %211 = vmatprep.subr.bf16.mxu0 %v234_v0  ;;  %v225_v1 = vld [vmem:[%s314_s1] sm:$0xff]   ;;  %219 = vmatprep.mubr.msk.bf16.mxu0 %vm235_vm1, %v234_v0  ;;  %29 = vst.msk [vmem:[#allocation2] sm:$0xff] %vm28_vm0, %v234_v0  ;;  %30 = vst.msk [vmem:[#allocation2 + $0x8] sm:$0xff] %vm28_vm0, %v234_v0  ;;  %v226_v2 = vld [vmem:[%s314_s1 + $0x8] sm:$0xff]  }
   0x2   :  { %212 = vmatpush3.bf16.msra.mxu0 %v225_v1  ;;  %v227_v3 = vld [vmem:[%s314_s1 + $0x10] sm:$0xff]   ;;  %v228_v4 = vld [vmem:[%s314_s1 + $0x18] sm:$0xff]   ;;  %v229_v5 = vld [vmem:[%s315_s0] sm:$0xff]  }
   0x3   :  { %213 = vmatprep.subr.bf16.mxu0 %v234_v0  ;;  %v203_v14 = vld [vmem:[%s316_s3] sm:$0xff]  }
   0x4   :  { %v199_v15 = vld [vmem:[%s317_s2] ss:$0 sm:$0xff]  ;;  %v204_v16 = vunpack.c.l.bf16 %v203_v14  ;;  %v205_v19 = vunpack.c.h.bf16 %v203_v14 }
   0x5   :  { %v200_v43 = vld [vmem:[%s318_s4] ss:$0 sm:$0xff] }
   0x6   :  { %214 = vmatpush3.bf16.msra.mxu0 %v226_v2  ;;  %v201_v45 = vld [vmem:[%s319_s5] ss:$0 sm:$0xff] }
   0x7   :  { %215 = vmatprep.subr.bf16.mxu0 %v234_v0 }
   0x8   :  { %v31_v6 = vld [vmem:[#allocation2] sm:$0xff]  ;;  %v32_v8 = vld [vmem:[#allocation2 + $0x8] sm:$0xff] }
   0xa   :  { %216 = vmatpush3.bf16.msra.mxu0 %v227_v3 }
   0xb   :  { %217 = vmatprep.subr.bf16.mxu0 %v234_v0 }
   0xe   :  { %218 = vmatpush3.bf16.msra.mxu0 %v228_v4 }
  0x11   :  { %220 = vmatmul.mubr.msk.bf16.vlgmr.msra.gmra.mrb[0].mxu0 %vm72_vm2, %v229_v5 }
  0xe4   :  { %v110_v7 = vpop.f32.mrb[0].mxu0 }
  0xe5   :  { %v117_v9 = vadd.f32 %v110_v7, %v31_v6  ;;  %v221_v10 = vpop.f32.mrb[1].mxu0 }
  0xe6   :  { %v113_v11 = vpop.f32.mrb[2].mxu0 }
  0xe7   :  { %120 = vst.msk [vmem:[#allocation2] sm:$0xff] %vm28_vm0, %v117_v9  ;;  %v118_v12 = vadd.f32 %v113_v11, %v32_v8  ;;  %v222_v13 = vpop.f32.mrb[3].mxu0 }
  0xe9   :  { %121 = vst.msk [vmem:[#allocation2 + $0x8] sm:$0xff] %vm28_vm0, %v118_v12 }
  0xee   :  { %v125_v17 = vld [vmem:[#allocation2] sm:$0xff] }
  0xef   :  { %v134_v18 = vadd.f32 %v199_v15, %v125_v17 }
  0xf0   :  { %v126_v20 = vld [vmem:[#allocation2 + $0x8] sm:$0xff] }
  0xf1   :  { %v140_v21 = vadd.f32 %v204_v16, %v134_v18  ;;  %v135_v22 = vadd.f32 %v199_v15, %v126_v20 }
  0xf3   :  { %v142_v23 = vsel %vm28_vm0, %v140_v21, 0.0  ;;  %v141_v24 = vadd.f32 %v205_v19, %v135_v22 }
  0xf4   :  { %143 = vadd.xlane.f32.xlu0 %v142_v23 }
  0xf5   :  { %v145_v25 = vsel %vm28_vm0, %v141_v24, 0.0 }
  0xf8   :  { %146 = vadd.xlane.f32.xlu0 %v145_v25 }
 0x181   :  { %v144_v26 = vpop.xlane.xlu0 %143 }
 0x182   :  { %v149_v27 = vmul.f32 0.03125, %v144_v26 }
 0x184   :  { %v151_v28 = vsub.f32 %v140_v21, %v149_v27 }
 0x185   :  { %v147_v29 = vpop.xlane.xlu0 %146 }
 0x186   :  { %v150_v30 = vmul.f32 0.03125, %v147_v29  ;;  %v153_v31 = vmul.f32 %v151_v28, %v151_v28 }
 0x188   :  { %v152_v32 = vsub.f32 %v141_v24, %v150_v30  ;;  %v155_v33 = vsel %vm28_vm0, %v153_v31, 0.0 }
 0x189   :  { %156 = vadd.xlane.f32.xlu1 %v155_v33 }
 0x18a   :  { %v154_v34 = vmul.f32 %v152_v32, %v152_v32 }
 0x18c   :  { %v158_v35 = vsel %vm28_vm0, %v154_v34, 0.0 }
 0x18d   :  { %159 = vadd.xlane.f32.xlu1 %v158_v35 }
 0x216   :  { %v157_v36 = vpop.xlane.xlu1 %156 }
 0x217   :  { %v161_v37 = vmul.f32 0.03125, %v157_v36 }
 0x219   :  { %v163_v38 = vadd.f32 1e-12, %v161_v37 }
 0x21a   :  { %v160_v39 = vpop.xlane.xlu1 %159 }
 0x21b   :  { %230 = vrsqrt.f32 %v163_v38  ;;  %v162_v40 = vmul.f32 0.03125, %v160_v39 }
 0x21d   :  { %v164_v41 = vadd.f32 1e-12, %v162_v40 }
 0x21f   :  { %232 = vrsqrt.f32 %v164_v41 }
 0x225   :  { %v231_v42 = vpop.eup %230 }
 0x226   :  { %v167_v44 = vmul.f32 %v231_v42, %v151_v28 }
 0x228   :  { %v176_v46 = vmul.f32 %v200_v43, %v167_v44 }
 0x229   :  { %v233_v47 = vpop.eup %232 }
 0x22a   :  { %v185_v48 = vadd.f32 %v201_v45, %v176_v46  ;;  %v168_v49 = vmul.f32 %v233_v47, %v152_v32 }
 0x22c   :  { %187 = vst.msk [vmem:[%s320_s6] sm:$0xff] %vm28_vm0, %v185_v48  ;;  %v177_v50 = vmul.f32 %v200_v43, %v168_v49 }
 0x22e   :  { %v186_v51 = vadd.f32 %v201_v45, %v177_v50 }
 0x230   :  { %188 = vst.msk [vmem:[%s320_s6 + $0x8] sm:$0xff] %vm28_vm0, %v186_v51 }

// kernel: seq_encoder_forward.14
= control target key start
LH: loop header
LB: loop body
LE: loop exit
PB: predicated region body
PF: predicated region fallthrough
CT: control target
= control target key end

     0   :  { %vm28_vm0 = vcmask 261120   ;;  %v247_v0 = vmov 0.0   ;;  %vm248_vm1 = vmmov 0   ;;  %vm72_vm2 = vcmask 523264   ;;  %s325_s1 = inlined_call_operand.vmem [shape: bf16[64,32], index: 1, kind: input, shape index: {}]   ;;  %s326_s0 = inlined_call_operand.vmem [shape: bf16[16,64], index: 0, kind: input, shape index: {}]   ;;  %s327_s3 = inlined_call_operand.vmem [shape: bf16[16,32], index: 3, kind: input, shape index: {}]   ;;  %s328_s2 = inlined_call_operand.vmem [shape: f32[1,32], index: 2, kind: input, shape index: {}]   ;;  %s329_s4 = inlined_call_operand.vmem [shape: f32[1,32], index: 4, kind: input, shape index: {}]   ;;  %s330_s5 = inlined_call_operand.vmem [shape: f32[1,32], index: 5, kind: input, shape index: {}]   ;;  %s331_s6 = inlined_call_operand.vmem [shape: bf16[16,32], index: 6, kind: output, shape index: {}]  }
   0x1   :  { %224 = vmatprep.subr.bf16.mxu0 %v247_v0  ;;  %v238_v1 = vld [vmem:[%s325_s1] sm:$0xff]   ;;  %232 = vmatprep.mubr.msk.bf16.mxu0 %vm248_vm1, %v247_v0  ;;  %29 = vst.msk [vmem:[#allocation2] sm:$0xff] %vm28_vm0, %v247_v0  ;;  %30 = vst.msk [vmem:[#allocation2 + $0x8] sm:$0xff] %vm28_vm0, %v247_v0  ;;  %v239_v2 = vld [vmem:[%s325_s1 + $0x8] sm:$0xff]   ;;  %vm195_vm3 = vcmask 257024  }
   0x2   :  { %225 = vmatpush3.bf16.msra.mxu0 %v238_v1  ;;  %v240_v3 = vld [vmem:[%s325_s1 + $0x10] sm:$0xff]   ;;  %v241_v4 = vld [vmem:[%s325_s1 + $0x18] sm:$0xff]   ;;  %v242_v5 = vld [vmem:[%s326_s0] sm:$0xff]  }
   0x3   :  { %226 = vmatprep.subr.bf16.mxu0 %v247_v0  ;;  %v216_v14 = vld [vmem:[%s327_s3] sm:$0xff]  }
   0x4   :  { %v208_v15 = vld [vmem:[%s328_s2] ss:$0 sm:$0xff]  ;;  %v217_v16 = vunpack.c.l.bf16 %v216_v14  ;;  %v218_v19 = vunpack.c.h.bf16 %v216_v14 }
   0x5   :  { %v209_v43 = vld [vmem:[%s329_s4] ss:$0 sm:$0xff] }
   0x6   :  { %227 = vmatpush3.bf16.msra.mxu0 %v239_v2  ;;  %v210_v45 = vld [vmem:[%s330_s5] ss:$0 sm:$0xff] }
   0x7   :  { %228 = vmatprep.subr.bf16.mxu0 %v247_v0 }
   0x8   :  { %v31_v6 = vld [vmem:[#allocation2] sm:$0xff]  ;;  %v32_v8 = vld [vmem:[#allocation2 + $0x8] sm:$0xff] }
   0xa   :  { %229 = vmatpush3.bf16.msra.mxu0 %v240_v3 }
   0xb   :  { %230 = vmatprep.subr.bf16.mxu0 %v247_v0 }
   0xe   :  { %231 = vmatpush3.bf16.msra.mxu0 %v241_v4 }
  0x11   :  { %233 = vmatmul.mubr.msk.bf16.vlgmr.msra.gmra.mrb[0].mxu0 %vm72_vm2, %v242_v5 }
  0xe4   :  { %v110_v7 = vpop.f32.mrb[0].mxu0 }
  0xe5   :  { %v117_v9 = vadd.f32 %v110_v7, %v31_v6  ;;  %v234_v10 = vpop.f32.mrb[1].mxu0 }
  0xe6   :  { %v113_v11 = vpop.f32.mrb[2].mxu0 }
  0xe7   :  { %120 = vst.msk [vmem:[#allocation2] sm:$0xff] %vm28_vm0, %v117_v9  ;;  %v118_v12 = vadd.f32 %v113_v11, %v32_v8  ;;  %v235_v13 = vpop.f32.mrb[3].mxu0 }
  0xe9   :  { %121 = vst.msk [vmem:[#allocation2 + $0x8] sm:$0xff] %vm28_vm0, %v118_v12 }
  0xee   :  { %v125_v17 = vld [vmem:[#allocation2] sm:$0xff] }
  0xef   :  { %v134_v18 = vadd.f32 %v208_v15, %v125_v17 }
  0xf0   :  { %v126_v20 = vld [vmem:[#allocation2 + $0x8] sm:$0xff] }
  0xf1   :  { %v140_v21 = vadd.f32 %v217_v16, %v134_v18  ;;  %v135_v22 = vadd.f32 %v208_v15, %v126_v20 }
  0xf3   :  { %v142_v23 = vsel %vm28_vm0, %v140_v21, 0.0  ;;  %v141_v24 = vadd.f32 %v218_v19, %v135_v22 }
  0xf4   :  { %143 = vadd.xlane.f32.xlu0 %v142_v23 }
  0xf5   :  { %v145_v25 = vsel %vm28_vm0, %v141_v24, 0.0 }
  0xf8   :  { %146 = vadd.xlane.f32.xlu0 %v145_v25 }
 0x181   :  { %v144_v26 = vpop.xlane.xlu0 %143 }
 0x182   :  { %v149_v27 = vmul.f32 0.03125, %v144_v26 }
 0x184   :  { %v151_v28 = vsub.f32 %v140_v21, %v149_v27 }
 0x185   :  { %v147_v29 = vpop.xlane.xlu0 %146 }
 0x186   :  { %v150_v30 = vmul.f32 0.03125, %v147_v29  ;;  %v153_v31 = vmul.f32 %v151_v28, %v151_v28 }
 0x188   :  { %v152_v32 = vsub.f32 %v141_v24, %v150_v30  ;;  %v155_v33 = vsel %vm28_vm0, %v153_v31, 0.0 }
 0x189   :  { %156 = vadd.xlane.f32.xlu1 %v155_v33 }
 0x18a   :  { %v154_v34 = vmul.f32 %v152_v32, %v152_v32 }
 0x18c   :  { %v158_v35 = vsel %vm28_vm0, %v154_v34, 0.0 }
 0x18d   :  { %159 = vadd.xlane.f32.xlu1 %v158_v35 }
 0x216   :  { %v157_v36 = vpop.xlane.xlu1 %156 }
 0x217   :  { %v161_v37 = vmul.f32 0.03125, %v157_v36 }
 0x219   :  { %v163_v38 = vadd.f32 1e-12, %v161_v37 }
 0x21a   :  { %v160_v39 = vpop.xlane.xlu1 %159 }
 0x21b   :  { %243 = vrsqrt.f32 %v163_v38  ;;  %v162_v40 = vmul.f32 0.03125, %v160_v39 }
 0x21d   :  { %v164_v41 = vadd.f32 1e-12, %v162_v40 }
 0x21f   :  { %245 = vrsqrt.f32 %v164_v41 }
 0x225   :  { %v244_v42 = vpop.eup %243 }
 0x226   :  { %v167_v44 = vmul.f32 %v244_v42, %v151_v28 }
 0x228   :  { %v176_v46 = vmul.f32 %v209_v43, %v167_v44 }
 0x229   :  { %v246_v47 = vpop.eup %245 }
 0x22a   :  { %v185_v48 = vadd.f32 %v210_v45, %v176_v46  ;;  %v168_v49 = vmul.f32 %v246_v47, %v152_v32 }
 0x22c   :  { %v213_v50 = vpack.c.bf16 %v185_v48, %v185_v48  ;;  %v177_v51 = vmul.f32 %v209_v43, %v168_v49 }
 0x22e   :  { %196 = vst.msk [vmem:[%s331_s6] sm:$0xf] %vm195_vm3, %v213_v50  ;;  %v186_v52 = vadd.f32 %v210_v45, %v177_v51 }
 0x230   :  { %v214_v53 = vpack.c.bf16 %v186_v52, %v186_v52 }
 0x232   :  { %197 = vst.msk [vmem:[%s331_s6 + $0x4] sm:$0xf] %vm195_vm3, %v214_v53 }

// kernel: seq_encoder_forward.19
= control target key start
LH: loop header
LB: loop body
LE: loop exit
PB: predicated region body
PF: predicated region fallthrough
CT: control target
= control target key end

     0   :  { %v161_v1 = vmov 0.0   ;;  %vm162_vm0 = vmmov 0   ;;  %vm20_vm1 = vcmask 254976   ;;  %s211_s0 = inlined_call_operand.vmem [shape: bf16[2,32], index: 0, kind: input, shape index: {}]   ;;  %s212_s1 = inlined_call_operand.vmem [shape: bf16[32,32], index: 1, kind: input, shape index: {}]   ;;  %s213_s2 = inlined_call_operand.vmem [shape: f32[1,32], index: 2, kind: input, shape index: {}]   ;;  %s214_s3 = inlined_call_operand.hbm [shape: f32[2,32], index: 3, kind: output, shape index: {}]  }
   0x1   :  { %v133_v0 = vld [vmem:[%s212_s1] sm:$0xff]   ;;  %122 = vmatprep.subr.bf16.mxu0 %v161_v1  ;;  %v134_v2 = vld [vmem:[%s212_s1 + $0x8] sm:$0xff]   ;;  %126 = vmatprep.mubr.msk.bf16.mxu0 %vm162_vm0, %v161_v1 }
   0x2   :  { %123 = vmatpush3.bf16.msra.mxu0 %v133_v0 }
   0x3   :  { %8 = vsyncpa [#allocation4], 0  ;;  %124 = vmatprep.subr.bf16.mxu0 %v161_v1  ;;  %21 = vst.msk [vmem:[#allocation2] sm:$0x3] %vm20_vm1, %v161_v1  ;;  %v23_v3 = vld [vmem:[%s211_s0] sm:$0x1] }
   0x4   :  { %vm40_vm2 = vcmask 261120   ;;  %v118_v10 = vld [vmem:[%s213_s2] ss:$0 sm:$0xff]  ;;  %s163_s19 = smov [#allocation3]  }
   0x5   :  { %s107_s20 = sshll.u32 %s163_s19, 4  ;;  %s108_s20 = int_to_ptr.vmem [resolvable:$true] %s107_s20 }
   0x6   :  { %125 = vmatpush3.bf16.msra.mxu0 %v134_v2  ;;  %s137_s0 = scalar_lea.vmem %s108_s20, 32  ;;  %p142_p1 = scmp.lt.s32.totalorder %s108_s20, %s108_s20 }
   0x7   :  { %p138_p0 = scmp.ne.s32.totalorder %s108_s20, %s137_s0  ;;  %p143_p2 = scmp.lt.s32.totalorder %s137_s0, %s137_s0 }
   0x9   :  { %127 = vmatmul.mubr.msk.bf16.vlgmr.msra.gmra.mrb[0].mxu0 %vm40_vm2, %v23_v3  ;;  %p144_p3 = por %p143_p2, %p142_p1 }
   0xa   :  { %v22_v4 = vld [vmem:[#allocation2] sm:$0x3] }
   0xb   :  { %p145_p4 = pnand %p144_p3, %p138_p0 }
  0xdc   :  { %v78_v5 = vpop.f32.mrb[0].mxu0 }
  0xdd   :  { %v84_v6 = vadd.f32 %v78_v5, %v22_v4  ;;  %v128_v7 = vpop.f32.mrb[1].mxu0 }
  0xde   :  { %v81_v8 = vpop.f32.mrb[2].mxu0 }
  0xdf   :  { %86 = vst.msk [vmem:[#allocation2] sm:$0x3] %vm20_vm1, %v84_v6  ;;  %v129_v9 = vpop.f32.mrb[3].mxu0 }
  0xe6   :  { %v90_v11 = vld [vmem:[#allocation2] sm:$0x3] }
  0xe7   :  { %v98_v12 = vadd.f32 %v118_v10, %v90_v11 }
  0xe9   :  { %135 = vtanh.f32 %v98_v12 }
  0xf3   :  { %v136_v13 = vpop.eup %135 }
  0xf4   :  { %100 = vst.msk [vmem:[#allocation3] sm:$0x3] %vm20_vm1, %v136_v13 }
  0xf5   :  { %148 = shalt.err (!%p145_p4)
}
  0xf6   :  { %s149_s2 = scalar_lea.hbm %s214_s3, 32 }
  0xf7   :  { %p150_p5 = scmp.ne.s32.totalorder %s214_s3, %s149_s2  ;;  %p153_p6 = scmp.lt.u32.totalorder %s149_s2, %s214_s3 }
  0xf9   :  { %p155_p7 = pnand %p153_p6, %p150_p5 }
  0xfb   :  { %158 = shalt.err (!%p155_p7)
}
  0xfc   :  { %110 = dma.vmem_to_hbm [thread:$0]  %s108_s20, 32, %s214_s3, [#allocation4]  }
  0xfd   :  { %159 = dma.done.wait [#allocation4], 32  }
  0xfe   :  { %160 = vsyncadd [#allocation4], 4294967264 }
  0xff   :  { %114 = vsyncpa [#allocation4], 1 }

</bundles_post_ra>
